<compile_context>
chip_gen: v5e
topology: v5e:2x2
jax: 0.10.0
libtpu: 0.0.40
codegen_flags: <defaults>
</compile_context>

<pallas_src>
import jax
import jax.numpy as jnp
from jax.experimental import pallas as pl
from jax.experimental.pallas import tpu as pltpu


def _stylemod_kernel(scale_ref, shift_ref, x_ref, o_ref):
    # scale_ref / shift_ref: (1, tc, 1)  -- scale already holds (style_scale + 1)
    # x_ref / o_ref:         (1, tc, thw)
    # Pure elementwise FMA in x's dtype; broadcasting handles the trailing 1.
    o_ref[...] = x_ref[...] * scale_ref[...] + shift_ref[...]


def _divisor_tile(dim, quantum, cap):
    """Largest divisor of `dim` that is a multiple of `quantum` and <= cap, or None."""
    best = None
    t = quantum
    limit = min(dim, cap)
    while t <= limit:
        if dim % t == 0:
            best = t
        t += quantum
    return best


def _tpu_generation():
    try:
        kind = jax.devices()[0].device_kind.lower()
    except Exception:
        return None
    for tag in ("v7", "v6", "v5"):
        if tag in kind:
            return tag
    return None


def stylemod_forward(x, latent, weight, bias, *, w_mul, b_mul,
                     target_block_bytes=None, min_pallas_bytes=1 << 20,
                     donate_x=False):
    """x: (N, C, H, W) NCHW; latent: (N, L); weight: (2C, L); bias: (2C,)."""
    N, C, H, W = x.shape
    HW = H * W
    itemsize = jnp.dtype(x.dtype).itemsize

    # ---- Style affine computed once, outside the kernel (one real MXU matmul). ----
    w_eff = weight.astype(jnp.float32) * w_mul                     # (2C, L)
    style = (latent.astype(jnp.float32) @ w_eff.T
             + bias.astype(jnp.float32) * b_mul)                   # (N, 2C)
    scale_p1 = (style[:, :C] + 1.0).astype(x.dtype)                # (N, C)
    shift = style[:, C:].astype(x.dtype)                           # (N, C)

    total_bytes = N * C * HW * itemsize

    # ---- Tiny layers / awkward lane widths: plain XLA fused broadcast FMA. ----
    # All StyleGAN 4x4 / 8x8 layers land here; avoids pallas_call fixed cost,
    # masked partial stores (HW % 128 != 0), and any materialized repeats.
    if total_bytes < min_pallas_bytes or HW % 128 != 0:
        return x * scale_p1.reshape(N, C, 1, 1) + shift.reshape(N, C, 1, 1)

    # ---- Generation-aware block budget. ----
    gen = _tpu_generation()
    if target_block_bytes is None:
        # v6e/v7x: 4 MiB blocks (x+out double-buffered = 16 MiB). v5e/unknown: 2 MiB.
        target_block_bytes = (4 << 20) if gen in ("v6", "v7") else (2 << 20)
    min_programs = 2 if gen == "v7" else 1          # keep both v7x TensorCores busy

    # Sublane quantum by dtype (bf16 packs 2 rows/sublane, int8/fp8 pack 4).
    sub_q = {1: 32, 2: 16, 4: 8}.get(itemsize, 8)
    budget_elems = max(128, target_block_bytes // itemsize)

    # Grow the lane axis first (prefer the whole contiguous row), then channels.
    if HW <= budget_elems:
        thw = HW
    else:
        thw = _divisor_tile(HW, 128, budget_elems) or 128
    rem_c = max(1, budget_elems // thw)
    tc = _divisor_tile(C, sub_q, rem_c) or _divisor_tile(C, 8, rem_c)
    if tc is None:
        # C has no 8-multiple divisor that fits: a full-dim channel block is the
        # only legal unmasked choice; shrink thw instead of overshooting VMEM.
        tc = C
        if C * thw > budget_elems:
            thw = _divisor_tile(HW, 128, max(128, budget_elems // C)) or 128

    # v7x: guarantee at least `min_programs` parallel blocks so no core idles.
    if N * (C // tc) * (HW // thw) < min_programs:
        split_hw = _divisor_tile(HW, 128, thw // 2) if thw > 128 else None
        if split_hw is not None:
            thw = split_hw
        else:
            split_c = _divisor_tile(C, 8, max(8, tc // 2)) if tc > 8 else None
            if split_c is not None:
                tc = split_c

    grid = (N, C // tc, HW // thw)

    x3 = x.reshape(N, C, HW)
    sc3 = scale_p1.reshape(N, C, 1)
    sh3 = shift.reshape(N, C, 1)

    sspec = pl.BlockSpec((1, tc, 1), lambda b, ci, si: (b, ci, 0))
    xspec = pl.BlockSpec((1, tc, thw), lambda b, ci, si: (b, ci, si))

    cost = pl.CostEstimate(
        flops=2 * N * C * HW,
        transcendentals=0,
        # read x + write out (dominant) + read scale & shift.
        bytes_accessed=2 * N * C * HW * itemsize + 2 * N * C * itemsize,
    )

    # Scoped-VMEM limit: double-buffered x + out blocks plus slack; never over
    # 48 MiB so it stays inside v7x's 64 MiB physical VMEM, never below the
    # generation's default scoped budget so we don't over-constrain the compiler.
    block_bytes = tc * thw * itemsize
    default_scoped = (32 << 20) if gen in ("v6", "v7") else (16 << 20)
    vmem_need = 4 * block_bytes + (2 << 20)
    vmem_limit = int(min(48 << 20, max(default_scoped, int(1.5 * vmem_need))))

    out3 = pl.pallas_call(
        _stylemod_kernel,
        out_shape=jax.ShapeDtypeStruct(x3.shape, x.dtype),
        grid_spec=pltpu.PrefetchScalarGridSpec(
            num_scalar_prefetch=0,
            grid=grid,
            in_specs=[sspec, sspec, xspec],
            out_specs=xspec,
        ),
        compiler_params=pltpu.CompilerParams(
            dimension_semantics=("parallel", "parallel", "parallel"),
            vmem_limit_bytes=vmem_limit),
        cost_estimate=cost,
        # Optional footprint win when x is not needed afterwards (inference).
        input_output_aliases=({2: 0} if donate_x else {}),
    )(sc3, sh3, x3)

    return out3.reshape(N, C, H, W)


def _reference(x, latent, weight, bias, *, w_mul, b_mul):
    style = latent @ (weight * w_mul).T + bias * b_mul             # (N, 2C)
    N, C = x.shape[0], x.shape[1]
    style = style.reshape(N, 2, C, 1, 1)
    return x * (style[:, 0] + 1.0) + style[:, 1]


if __name__ == "__main__":
    # MyLinear(latent_size, 2*C, gain=1.0, use_wscale=True) parameter setup.
    latent_size = 32
    gain, lrmul, use_wscale = 1.0, 1.0, True
    he_std = gain * latent_size ** (-0.5)
    if use_wscale:
        init_std = 1.0 / lrmul
        w_mul = he_std * lrmul
    else:
        init_std = he_std / lrmul
        w_mul = lrmul
    b_mul = lrmul

    root = jax.random.PRNGKey(0)

    def make_case(key, N, C, H, W):
        kx, kl, kw = jax.random.split(key, 3)
        xx = jax.random.normal(kx, (N, C, H, W), dtype=jnp.float32)
        lt = jax.random.normal(kl, (N, latent_size), dtype=jnp.float32)
        wt = jax.random.normal(kw, (2 * C, latent_size), dtype=jnp.float32) * init_std
        bs = jnp.zeros((2 * C,), dtype=jnp.float32)
        return xx, lt, wt, bs

    keys = jax.random.split(root, 4)
    cases = [
        # Primary small shape (tiny-layer XLA bypass by design).
        ((2, 4, 16, 16), {}),
        # Low-resolution 4x4 layer (bypass: HW % 128 != 0 and sub-MiB).
        ((2, 64, 4, 4), {}),
        # Mid-size layer: exercises the Pallas kernel via default routing.
        ((2, 16, 128, 128), {}),
        # Force the Pallas path at the tiny shape too (full-C block path).
        ((2, 4, 16, 16), {"min_pallas_bytes": 0}),
    ]

    for key, (shape, kwargs) in zip(keys, cases):
        x, latent, weight, bias = make_case(key, *shape)
        out = stylemod_forward(x, latent, weight, bias,
                               w_mul=w_mul, b_mul=b_mul, **kwargs)
        out = jax.block_until_ready(out)
        ref = _reference(x, latent, weight, bias, w_mul=w_mul, b_mul=b_mul)
        assert out.shape == x.shape
        assert jnp.allclose(out, ref, atol=1e-5, rtol=1e-5), \
            f"mismatch vs reference for shape {shape} kwargs {kwargs}"

    print("KERNEL_OK")
</pallas_src>

<mosaic_0001>
module attributes {stable_mosaic.version = 11 : i64} {
  func.func @_stylemod_kernel(%arg0: i32, %arg1: i32, %arg2: i32, %arg3: memref<1x16x1xf32, #tpu.memory_space<vmem>>, %arg4: memref<1x16x1xf32, #tpu.memory_space<vmem>>, %arg5: memref<1x16x16384xf32, #tpu.memory_space<vmem>>, %arg6: memref<1x16x16384xf32, #tpu.memory_space<vmem>>) attributes {dimension_semantics = [#tpu.dimension_semantics<parallel>, #tpu.dimension_semantics<parallel>, #tpu.dimension_semantics<parallel>], iteration_bounds = array<i64: 2, 1, 1>, scalar_prefetch = 0 : i64, scratch_operands = 0 : i64, tpu.core_type = #tpu.core_type<tc>, window_params = [{transform_indices = @transform_0, window_bounds = array<i64: 1, 16, 1>}, {transform_indices = @transform_1, window_bounds = array<i64: 1, 16, 1>}, {transform_indices = @transform_2, window_bounds = array<i64: 1, 16, 16384>}, {transform_indices = @transform_3, window_bounds = array<i64: 1, 16, 16384>}]} {
    %c0 = arith.constant 0 : index
    %c0_0 = arith.constant 0 : index
    %c0_1 = arith.constant 0 : index
    %0 = vector.load %arg5[%c0, %c0_0, %c0_1] : memref<1x16x16384xf32, #tpu.memory_space<vmem>>, vector<1x16x16384xf32>
    %c0_2 = arith.constant 0 : index
    %c0_3 = arith.constant 0 : index
    %c0_4 = arith.constant 0 : index
    %1 = vector.load %arg3[%c0_2, %c0_3, %c0_4] : memref<1x16x1xf32, #tpu.memory_space<vmem>>, vector<1x16x1xf32>
    %2 = vector.broadcast %1 : vector<1x16x1xf32> to vector<1x16x16384xf32>
    %3 = arith.mulf %0, %2 : vector<1x16x16384xf32>
    %c0_5 = arith.constant 0 : index
    %c0_6 = arith.constant 0 : index
    %c0_7 = arith.constant 0 : index
    %4 = vector.load %arg4[%c0_5, %c0_6, %c0_7] : memref<1x16x1xf32, #tpu.memory_space<vmem>>, vector<1x16x1xf32>
    %5 = vector.broadcast %4 : vector<1x16x1xf32> to vector<1x16x16384xf32>
    %6 = arith.addf %3, %5 : vector<1x16x16384xf32>
    %c0_8 = arith.constant 0 : index
    %c0_9 = arith.constant 0 : index
    %c0_10 = arith.constant 0 : index
    %7 = vector.load %arg6[%c0_8, %c0_9, %c0_10] : memref<1x16x16384xf32, #tpu.memory_space<vmem>>, vector<1x16x16384xf32>
    tpu.vector_store %arg6[%c0_8, %c0_9, %c0_10], %6 {strides = array<i32>} : memref<1x16x16384xf32, #tpu.memory_space<vmem>>, vector<1x16x16384xf32>,
    return
  }
  func.func @transform_0(%arg0: i32, %arg1: i32, %arg2: i32) -> (i32, i32, i32) {
    %c0_i32 = arith.constant 0 : i32
    %c0_i32_0 = arith.constant 0 : i32
    return %arg0, %arg1, %c0_i32 : i32, i32, i32
  }
  func.func @transform_1(%arg0: i32, %arg1: i32, %arg2: i32) -> (i32, i32, i32) {
    %c0_i32 = arith.constant 0 : i32
    %c0_i32_0 = arith.constant 0 : i32
    return %arg0, %arg1, %c0_i32 : i32, i32, i32
  }
  func.func @transform_2(%arg0: i32, %arg1: i32, %arg2: i32) -> (i32, i32, i32) {
    %c0_i32 = arith.constant 0 : i32
    return %arg0, %arg1, %arg2 : i32, i32, i32
  }
  func.func @transform_3(%arg0: i32, %arg1: i32, %arg2: i32) -> (i32, i32, i32) {
    %c0_i32 = arith.constant 0 : i32
    return %arg0, %arg1, %arg2 : i32, i32, i32
  }
}

</mosaic_0001>

<bundles_post_ra>
// kernel: tpu_custom_call.1
= control target key start
LH: loop header
LB: loop body
LE: loop exit
PB: predicated region body
PF: predicated region fallthrough
CT: control target
= control target key end

     0   :  { %8 = vsyncpa [#allocation3], 0  ;;  %s3492_s0 = inlined_call_operand.vmem [shape: f32[2,16,1], index: 0, kind: input, shape index: {}]   ;;  %s3493_s1 = inlined_call_operand.vmem [shape: f32[2,16,1], index: 1, kind: input, shape index: {}]   ;;  %s3494_s2 = inlined_call_operand.hbm [shape: f32[2,16,16384], index: 2, kind: input, shape index: {}]   ;;  %s3495_s3 = inlined_call_operand.hbm [shape: f32[2,16,16384], index: 3, kind: output, shape index: {}]  }
   0x1   :  { %10 = vsyncpa [#allocation3 + $0x1], 0 }
   0x2   :  { %11 = vsyncpa [#allocation4], 0 }
   0x3   :  { %13 = vsyncpa [#allocation4 + $0x1], 0  ;;  %s1729_s12 = smov 0   ;;  %s1731_s13 = smov 0  }
   0x4   :  { %s1733_s14 = smov 0   ;;  %s1735_s15 = smov 0  }
   0x5   :  { %s1737_s16 = smov 0   ;;  %s1739_s17 = smov 0  }
   0x6 LB: > { %s1498_s18 = sadd.s32 4294967295, %s1702_s17   ;;  %s1499_s19 = sadd.s32 4294967294, %s1702_s17   ;;  %s1702_s17 = sphi %s1739_s17, %s19_s17   ;;  %s1698_s16 = sphi %s1737_s16, %s3640_s16   ;;  %s1694_s15 = sphi %s1735_s15, %s3639_s15   ;;  %s1690_s14 = sphi %s1733_s14, %s3638_s14   ;;  %s1686_s13 = sphi %s1731_s13, %s3637_s13   ;;  %s1682_s12 = sphi %s1729_s12, %s3636_s12  }
   0x7   : > { %s38_s20 = sadd.s32 1, %s1698_s16  ;;  %s105_s21 = sadd.s32 1, %s1690_s14 }
   0x8   : > { %p40_p0 = scmp.ge.s32.totalorder %s38_s20, 2  ;;  %p112_p1 = scmp.ne.s32.totalorder %s1690_s14, %s1686_s13 }
   0x9   : > { %p113_p2 = scmp.eq.s32.totalorder %s1702_s17, 0  ;;  %p118_p3 = scmp.ne.s32.totalorder %s1686_s13, %s1682_s12 }
   0xa   : > { %s3642_s20 = smov (%p40_p0, %s38_s20), 0  ;;  %p119_p5 = scmp.eq.s32.totalorder %s1498_s18, 0 }
   0xb   : > { %p1770_p4 = por %p113_p2, %p112_p1  ;;  %s98_s23 = ssub.s32 %s1698_s16, %s3642_s20 }
   0xc   : > { %p146_p6 = scmp.eq.s32.totalorder %s1498_s18, 1  ;;  %p103_p7 = scmp.eq.s32.totalorder %s98_s23, 0 }
   0xd   : > { %p1776_p8 = por %p119_p5, %p118_p3  ;;  %p152_p10 = scmp.eq.s32.totalorder %s1499_s19, 1 }
   0xe   : > { %p1780_p9 = por %p146_p6, %p112_p1  ;;  %p1501_p12 = scmp.ge.s32.totalorder %s1702_s17, 2 }
   0xf   : > { %s1785_s26 = scalar_select %p103_p7, %s1690_s14, %s105_s21  }
  0x10   : > { %p1787_p11 = por %p152_p10, %p118_p3  ;;  %p1533_p13 = scmp.lt.s32.totalorder %s1702_s17, 2 }
  0x11   : > { %s198_s28 = sand.u32 1, %s1690_s14   ;;  %s1517_s30 = sshll.u32 %s1698_s16, 11 }
  0x12   : > { %s1502_s29 = sshll.u32 %s198_s28, 11  ;;  %s212_s6 = scalar_lea.hbm %s3494_s2, %s1517_s30 }
  0x13   : > { %s202_s7 = scalar_lea.vmem [#allocation2], %s1502_s29  ;;  %s213_s9 = sshll.u32 %s212_s6, 4  ;;  %s214_s9 = int_to_ptr.hbm [resolvable:$true] %s213_s9 }
  0x14   : > { %s215_s8 = sshll.u32 %s202_s7, 4  ;;  %p1526_p0 = pnand %p1533_p13, %p1770_p4  ;;  %s216_s8 = int_to_ptr.vmem [resolvable:$true] %s215_s8 }
  0x15   : > { %p1505_p1 = scmp.ge.s32.totalorder %s1702_s17, 1  ;;  %s199_s10 = scalar_lea.sflag [#allocation3], %s198_s28 }
  0x16   : > { %s1704_s11 = smov 16384   ;;  %s1705_s18 = smov 1024  }
  0x17   : > { %1528 = dma.hbm_to_vmem [thread:$0]  (!%p1526_p0), %s214_s9, 32768, %s216_s8, %s199_s10, %s1704_s11, %s1704_s11, %s1705_s18  }
  0x18   : > { %p223_p2 = scmp.lt.s32.totalorder %s1702_s17, 3 }
  0x1a   : > { %p224_p3 = pnand %p1505_p1, %p223_p2 }
  0x1c   : > { %227 = sbr.rel (%p224_p3) target bundleno = 489 (0x1e9), region = 32 }
  0x21   : > { %s1803_s19 = sand.u32 1, %s1686_s13  }
  0x22   : > { %s1506_s21 = sshll.u32 %s1803_s19, 11  ;;  %s230_s23 = scalar_lea.sflag [#allocation3], %s1803_s19 }
  0x23   : > { %s1809_s22 = scalar_lea.vmem [#allocation2], %s1506_s21 }
  0x24   : > { %1673 = dma.done.wait (%p1776_p8), %s230_s23, 32768  }
  0x25   : > { %1675 = vsyncadd (%p1776_p8), %s230_s23, 4294934528  ;;  %p276_p4 = scmp.lt.s32.totalorder %s1694_s15, 1  ;;  %v1706_v0 = vmov 0   ;;  %v299_v6 = vld [vmem:[%s1809_s22] sm:$0xff]  ;;  %v300_v7 = vld [vmem:[%s1809_s22 + $0x8] sm:$0xff]  ;;  %s1881_s8 = scalar_lea.vmem [#allocation5], %s1506_s21 }
  0x26   : > { %1589 = vset.pattern.permute.xlu1 %v1706_v0  ;;  %1588 = vset.pattern.permute.xlu0 %v1706_v0  ;;  %v301_v8 = vld [vmem:[%s1809_s22 + $0x10] sm:$0xff]  ;;  %v302_v9 = vld [vmem:[%s1809_s22 + $0x18] sm:$0xff]  ;;  %v303_v10 = vld [vmem:[%s1809_s22 + $0x20] sm:$0xff]  ;;  %s1520_s9 = sshll.u32 %s1694_s15, 11  ;;  %s1348_s23 = scalar_lea.sflag [#allocation4], %s1803_s19 }
  0x27   : > { %s277_s28 = scalar_select %p276_p4, %s1694_s15, 1  ;;  %v304_v11 = vld [vmem:[%s1809_s22 + $0x28] sm:$0xff]  ;;  %v305_v12 = vld [vmem:[%s1809_s22 + $0x30] sm:$0xff]  ;;  %v306_v13 = vld [vmem:[%s1809_s22 + $0x38] sm:$0xff] }
  0x28   : > { %v307_v17 = vld [vmem:[%s1809_s22 + $0x40] sm:$0xff]  ;;  %v308_v19 = vld [vmem:[%s1809_s22 + $0x48] sm:$0xff]  ;;  %v309_v20 = vld [vmem:[%s1809_s22 + $0x50] sm:$0xff]  ;;  %s1364_s18 = scalar_lea.hbm %s3495_s3, %s1520_s9  ;;  %s1365_s15 = sshll.u32 %s1881_s8, 4  ;;  %s1366_s15 = int_to_ptr.vmem [resolvable:$true] %s1365_s15 }
  0x29   : > { %s1518_s29 = sshll.u32 %s277_s28, 4  ;;  %v310_v21 = vld [vmem:[%s1809_s22 + $0x58] sm:$0xff]  ;;  %v311_v24 = vld [vmem:[%s1809_s22 + $0x60] sm:$0xff]  ;;  %v312_v25 = vld [vmem:[%s1809_s22 + $0x68] sm:$0xff]  ;;  %s1367_s21 = sshll.u32 %s1364_s18, 4  ;;  %s1368_s21 = int_to_ptr.hbm [resolvable:$true] %s1367_s21 }
  0x2a   : > { %s293_s5 = scalar_lea.vmem %s3493_s1, %s1518_s29  ;;  %s283_s7 = scalar_lea.vmem %s3492_s0, %s1518_s29  ;;  %v313_v26 = vld [vmem:[%s1809_s22 + $0x70] sm:$0xff]  ;;  %v314_v30 = vld [vmem:[%s1809_s22 + $0x78] sm:$0xff]  ;;  %v315_v31 = vld [vmem:[%s1809_s22 + $0x80] sm:$0xff] }
  0x2b   : > { %v823_v1 = vld [vmem:[%s293_s5] sm:$0xff]  ;;  %v824_v3 = vld [vmem:[%s293_s5 + $0x8] sm:$0xff]  ;;  %v317_v37 = vld [vmem:[%s1809_s22 + $0x90] sm:$0xff]  ;;  %s1640_s4 = scalar_lea.hbm %s3495_s3, 4096 }
  0x2c   : > { %v555_v2 = vld [vmem:[%s283_s7] sm:$0xff]  ;;  %827 = vperm.xlu1 %1589, %v823_v1   ;;  %v556_v4 = vld [vmem:[%s283_s7 + $0x8] sm:$0xff]  ;;  %v318_v38 = vld [vmem:[%s1809_s22 + $0x98] sm:$0xff] }
  0x2d   : > { %559 = vperm.xlu0 %1588, %v555_v2   ;;  %v316_v32 = vld [vmem:[%s1809_s22 + $0x88] sm:$0xff]  ;;  %v319_v39 = vld [vmem:[%s1809_s22 + $0xa0] sm:$0xff]  ;;  %v321_v45 = vld [vmem:[%s1809_s22 + $0xb0] sm:$0xff] }
  0x2e   : > { %v320_v44 = vld [vmem:[%s1809_s22 + $0xa8] sm:$0xff]  ;;  %v322_v46 = vld [vmem:[%s1809_s22 + $0xb8] sm:$0xff]  ;;  %v323_v51 = vld [vmem:[%s1809_s22 + $0xc0] sm:$0xff] }
  0x2f   : > { %v324_v52 = vld [vmem:[%s1809_s22 + $0xc8] sm:$0xff]  ;;  %v325_v53 = vld [vmem:[%s1809_s22 + $0xd0] sm:$0xff]  ;;  %v326_v58 = vld [vmem:[%s1809_s22 + $0xd8] sm:$0xff] }
  0x30   : > { %v327_v59 = vld [vmem:[%s1809_s22 + $0xe0] sm:$0xff]  ;;  %v328_v60 = vld [vmem:[%s1809_s22 + $0xe8] sm:$0xff]  ;;  %v329_v1 = vld [vmem:[%s1809_s22 + $0xf0] sm:$0xff] }
  0x31   : > { %v330_v2 = vld [vmem:[%s1809_s22 + $0xf8] sm:$0xff] }
  0x34   : > { %832 = vperm.xlu1 %1589, %v824_v3   ;;  %v331_v3 = vld [vmem:[%s1809_s22 + $0x100] sm:$0xff] }
  0x35   : > { %564 = vperm.xlu0 %1588, %v556_v4  }
  0x9e   : > { %v1842_v23 = vpop.permute.xlu1 %827 }
  0x9f   : > { %v1823_v5 = vpop.permute.xlu0 %559 }
  0xa0   : > { %3502 = vst [vmem:[#allocation8_spill] sm:$0xff] %v1823_v5  ;;  %v567_v14 = vmul.f32 %v1823_v5, %v299_v6  ;;  %v568_v15 = vmul.f32 %v1823_v5, %v300_v7  ;;  %v569_v16 = vmul.f32 %v1823_v5, %v301_v8  ;;  %v570_v18 = vmul.f32 %v1823_v5, %v302_v9  ;;  %v332_v9 = vld [vmem:[%s1809_s22 + $0x108] sm:$0xff] }
  0xa1   : > { %v571_v22 = vmul.f32 %v1823_v5, %v303_v10  ;;  %v572_v27 = vmul.f32 %v1823_v5, %v304_v11  ;;  %v573_v28 = vmul.f32 %v1823_v5, %v305_v12  ;;  %v574_v29 = vmul.f32 %v1823_v5, %v306_v13  ;;  %v333_v10 = vld [vmem:[%s1809_s22 + $0x110] sm:$0xff]  ;;  %v334_v11 = vld [vmem:[%s1809_s22 + $0x118] sm:$0xff] }
  0xa2   : > { %v575_v33 = vmul.f32 %v1823_v5, %v307_v17  ;;  %v835_v34 = vadd.f32 %v1842_v23, %v567_v14  ;;  %v836_v35 = vadd.f32 %v1842_v23, %v568_v15  ;;  %v837_v36 = vadd.f32 %v1842_v23, %v569_v16  ;;  %v335_v16 = vld [vmem:[%s1809_s22 + $0x120] sm:$0xff]  ;;  %v336_v17 = vld [vmem:[%s1809_s22 + $0x128] sm:$0xff] }
  0xa3   : > { %v576_v40 = vmul.f32 %v1823_v5, %v308_v19  ;;  %v577_v41 = vmul.f32 %v1823_v5, %v309_v20  ;;  %v1863_v42 = vmul.f32 %v1823_v5, %v310_v21  ;;  %v838_v43 = vadd.f32 %v1842_v23, %v570_v18  ;;  %v337_v18 = vld [vmem:[%s1809_s22 + $0x130] sm:$0xff] }
  0xa4   : > { %v1870_v47 = vmul.f32 %v1823_v5, %v311_v24  ;;  %v1873_v48 = vmul.f32 %v1823_v5, %v312_v25  ;;  %v1876_v49 = vmul.f32 %v1823_v5, %v313_v26  ;;  %v839_v50 = vadd.f32 %v1842_v23, %v571_v22  ;;  %1091 = vst [vmem:[%s1881_s8] sm:$0xff] %v835_v34  ;;  %v338_v24 = vld [vmem:[%s1809_s22 + $0x138] sm:$0xff]  ;;  %v339_v25 = vld [vmem:[%s1809_s22 + $0x140] sm:$0xff]  ;;  %v340_v26 = vld [vmem:[%s1809_s22 + $0x148] sm:$0xff] }
  0xa5   : > { %v1888_v54 = vmul.f32 %v1823_v5, %v314_v30  ;;  %v1891_v55 = vmul.f32 %v1823_v5, %v315_v31  ;;  %v1894_v56 = vmul.f32 %v1823_v5, %v316_v32  ;;  %v840_v57 = vadd.f32 %v1842_v23, %v572_v27  ;;  %1092 = vst [vmem:[%s1881_s8 + $0x8] sm:$0xff] %v836_v35  ;;  %v341_v31 = vld [vmem:[%s1809_s22 + $0x150] sm:$0xff]  ;;  %v342_v32 = vld [vmem:[%s1809_s22 + $0x158] sm:$0xff] }
  0xa6   : > { %v1902_v61 = vmul.f32 %v1823_v5, %v317_v37  ;;  %v1905_v62 = vmul.f32 %v1823_v5, %v318_v38  ;;  %v1908_v63 = vmul.f32 %v1823_v5, %v319_v39  ;;  %v841_v0 = vadd.f32 %v1842_v23, %v573_v28  ;;  %1093 = vst [vmem:[%s1881_s8 + $0x10] sm:$0xff] %v837_v36  ;;  %v344_v38 = vld [vmem:[%s1809_s22 + $0x168] sm:$0xff]  ;;  %v345_v39 = vld [vmem:[%s1809_s22 + $0x170] sm:$0xff] }
  0xa7   : > { %v1916_v4 = vmul.f32 %v1823_v5, %v320_v44  ;;  %v1919_v6 = vmul.f32 %v1823_v5, %v321_v45  ;;  %v1922_v7 = vmul.f32 %v1823_v5, %v322_v46  ;;  %v842_v8 = vadd.f32 %v1842_v23, %v574_v29  ;;  %1094 = vst [vmem:[%s1881_s8 + $0x18] sm:$0xff] %v838_v43  ;;  %v347_v45 = vld [vmem:[%s1809_s22 + $0x180] sm:$0xff]  ;;  %v348_v46 = vld [vmem:[%s1809_s22 + $0x188] sm:$0xff] }
  0xa8   : > { %v1930_v12 = vmul.f32 %v1823_v5, %v323_v51  ;;  %v1933_v13 = vmul.f32 %v1823_v5, %v324_v52  ;;  %v1936_v14 = vmul.f32 %v1823_v5, %v325_v53  ;;  %v843_v15 = vadd.f32 %v1842_v23, %v575_v33  ;;  %1095 = vst [vmem:[%s1881_s8 + $0x20] sm:$0xff] %v839_v50  ;;  %v343_v33 = vld [vmem:[%s1809_s22 + $0x160] sm:$0xff]  ;;  %v349_v50 = vld [vmem:[%s1809_s22 + $0x190] sm:$0xff] }
  0xa9   : > { %v1944_v19 = vmul.f32 %v1823_v5, %v326_v58  ;;  %v1947_v20 = vmul.f32 %v1823_v5, %v327_v59  ;;  %v1950_v21 = vmul.f32 %v1823_v5, %v328_v60  ;;  %v844_v22 = vadd.f32 %v1842_v23, %v576_v40  ;;  %1096 = vst [vmem:[%s1881_s8 + $0x28] sm:$0xff] %v840_v57  ;;  %v346_v40 = vld [vmem:[%s1809_s22 + $0x178] sm:$0xff]  ;;  %v351_v58 = vld [vmem:[%s1809_s22 + $0x1a0] sm:$0xff]  ;;  %v352_v59 = vld [vmem:[%s1809_s22 + $0x1a8] sm:$0xff] }
  0xaa   : > { %v1958_v27 = vmul.f32 %v1823_v5, %v329_v1  ;;  %v1961_v28 = vmul.f32 %v1823_v5, %v330_v2  ;;  %v1964_v29 = vmul.f32 %v1823_v5, %v331_v3  ;;  %v845_v30 = vadd.f32 %v1842_v23, %v577_v41  ;;  %1097 = vst [vmem:[%s1881_s8 + $0x30] sm:$0xff] %v841_v0  ;;  %v350_v57 = vld [vmem:[%s1809_s22 + $0x198] sm:$0xff]  ;;  %v353_v2 = vld [vmem:[%s1809_s22 + $0x1b0] sm:$0xff] }
  0xab   : > { %v1972_v34 = vmul.f32 %v1823_v5, %v332_v9  ;;  %v1975_v35 = vmul.f32 %v1823_v5, %v333_v10  ;;  %v1978_v36 = vmul.f32 %v1823_v5, %v334_v11  ;;  %v846_v37 = vadd.f32 %v1842_v23, %v1863_v42  ;;  %1098 = vst [vmem:[%s1881_s8 + $0x38] sm:$0xff] %v842_v8  ;;  %v354_v3 = vld [vmem:[%s1809_s22 + $0x1b8] sm:$0xff]  ;;  %v355_v8 = vld [vmem:[%s1809_s22 + $0x1c0] sm:$0xff] }
  0xac   : > { %v1987_v41 = vmul.f32 %v1823_v5, %v335_v16  ;;  %v1990_v43 = vmul.f32 %v1823_v5, %v336_v17  ;;  %v1993_v44 = vmul.f32 %v1823_v5, %v337_v18  ;;  %v847_v42 = vadd.f32 %v1842_v23, %v1870_v47  ;;  %1099 = vst [vmem:[%s1881_s8 + $0x40] sm:$0xff] %v843_v15  ;;  %v356_v15 = vld [vmem:[%s1809_s22 + $0x1c8] sm:$0xff]  ;;  %v357_v16 = vld [vmem:[%s1809_s22 + $0x1d0] sm:$0xff]  ;;  %v358_v17 = vld [vmem:[%s1809_s22 + $0x1d8] sm:$0xff] }
  0xad   : > { %v2002_v51 = vmul.f32 %v1823_v5, %v338_v24  ;;  %v2005_v52 = vmul.f32 %v1823_v5, %v339_v25  ;;  %v2008_v53 = vmul.f32 %v1823_v5, %v340_v26  ;;  %v848_v47 = vadd.f32 %v1842_v23, %v1873_v48  ;;  %1100 = vst [vmem:[%s1881_s8 + $0x48] sm:$0xff] %v844_v22  ;;  %v359_v25 = vld [vmem:[%s1809_s22 + $0x1e0] sm:$0xff]  ;;  %v360_v26 = vld [vmem:[%s1809_s22 + $0x1e8] sm:$0xff] }
  0xae   : > { %v2017_v60 = vmul.f32 %v1823_v5, %v341_v31  ;;  %v2020_v0 = vmul.f32 %v1823_v5, %v342_v32  ;;  %v2023_v1 = vmul.f32 %v1823_v5, %v343_v33  ;;  %v849_v48 = vadd.f32 %v1842_v23, %v1876_v49  ;;  %1101 = vst [vmem:[%s1881_s8 + $0x50] sm:$0xff] %v845_v30  ;;  %v361_v30 = vld [vmem:[%s1809_s22 + $0x1f0] sm:$0xff] }
  0xaf   : > { %v2032_v9 = vmul.f32 %v1823_v5, %v344_v38  ;;  %v2035_v10 = vmul.f32 %v1823_v5, %v345_v39  ;;  %v2038_v11 = vmul.f32 %v1823_v5, %v346_v40  ;;  %v850_v49 = vadd.f32 %v1842_v23, %v1888_v54  ;;  %1102 = vst [vmem:[%s1881_s8 + $0x58] sm:$0xff] %v846_v37  ;;  %v362_v37 = vld [vmem:[%s1809_s22 + $0x1f8] sm:$0xff]  ;;  %v363_v38 = vld [vmem:[%s1809_s22 + $0x200] sm:$0xff]  ;;  %v364_v39 = vld [vmem:[%s1809_s22 + $0x208] sm:$0xff] }
  0xb0   : > { %v2047_v18 = vmul.f32 %v1823_v5, %v347_v45  ;;  %v2050_v22 = vmul.f32 %v1823_v5, %v348_v46  ;;  %v2053_v24 = vmul.f32 %v1823_v5, %v349_v50  ;;  %v851_v54 = vadd.f32 %v1842_v23, %v1891_v55  ;;  %1103 = vst [vmem:[%s1881_s8 + $0x60] sm:$0xff] %v847_v42  ;;  %v365_v46 = vld [vmem:[%s1809_s22 + $0x210] sm:$0xff]  ;;  %v366_v50 = vld [vmem:[%s1809_s22 + $0x218] sm:$0xff] }
  0xb1   : > { %v2062_v31 = vmul.f32 %v1823_v5, %v350_v57  ;;  %v2065_v32 = vmul.f32 %v1823_v5, %v351_v58  ;;  %v2068_v33 = vmul.f32 %v1823_v5, %v352_v59  ;;  %v852_v55 = vadd.f32 %v1842_v23, %v1894_v56  ;;  %1104 = vst [vmem:[%s1881_s8 + $0x68] sm:$0xff] %v848_v47  ;;  %v367_v47 = vld [vmem:[%s1809_s22 + $0x220] sm:$0xff] }
  0xb2   : > { %v2077_v40 = vmul.f32 %v1823_v5, %v353_v2  ;;  %v2080_v42 = vmul.f32 %v1823_v5, %v354_v3  ;;  %v2083_v45 = vmul.f32 %v1823_v5, %v355_v8  ;;  %v853_v56 = vadd.f32 %v1842_v23, %v1902_v61  ;;  %1105 = vst [vmem:[%s1881_s8 + $0x70] sm:$0xff] %v849_v48  ;;  %v2103_v48 = vpop.permute.xlu0 %564  ;;  %v368_v2 = vld [vmem:[%s1809_s22 + $0x228] sm:$0xff]  ;;  %v491_v3 = vld [vmem:[%s1809_s22 + $0x600] sm:$0xff] }
  0xb3   : > { %v2092_v57 = vmul.f32 %v1823_v5, %v356_v15  ;;  %v2095_v58 = vmul.f32 %v1823_v5, %v357_v16  ;;  %v2098_v59 = vmul.f32 %v1823_v5, %v358_v17  ;;  %v854_v61 = vadd.f32 %v1842_v23, %v1905_v62  ;;  %1106 = vst [vmem:[%s1881_s8 + $0x78] sm:$0xff] %v850_v49  ;;  %v492_v8 = vld [vmem:[%s1809_s22 + $0x608] sm:$0xff]  ;;  %v493_v49 = vld [vmem:[%s1809_s22 + $0x610] sm:$0xff] }
  0xb4   : > { %v2109_v15 = vmul.f32 %v1823_v5, %v359_v25  ;;  %v2112_v16 = vmul.f32 %v1823_v5, %v360_v26  ;;  %v2115_v17 = vmul.f32 %v1823_v5, %v361_v30  ;;  %v855_v62 = vadd.f32 %v1842_v23, %v1908_v63  ;;  %1107 = vst [vmem:[%s1881_s8 + $0x80] sm:$0xff] %v851_v54  ;;  %v496_v54 = vld [vmem:[%s1809_s22 + $0x628] sm:$0xff] }
  0xb5   : > { %3503 = vst [vmem:[#allocation9_spill] sm:$0xff] %v2095_v58  ;;  %v495_v58 = vld [vmem:[%s1809_s22 + $0x620] sm:$0xff]  ;;  %v2124_v25 = vmul.f32 %v1823_v5, %v362_v37  ;;  %v2127_v26 = vmul.f32 %v1823_v5, %v363_v38  ;;  %v2130_v30 = vmul.f32 %v1823_v5, %v364_v39  ;;  %v856_v63 = vadd.f32 %v1842_v23, %v1916_v4 }
  0xb6   : > { %3504 = vst [vmem:[#allocation10_spill] sm:$0xff] %v2098_v59  ;;  %v494_v59 = vld [vmem:[%s1809_s22 + $0x618] sm:$0xff]  ;;  %v2139_v37 = vmul.f32 %v1823_v5, %v365_v46  ;;  %v2142_v38 = vmul.f32 %v1823_v5, %v366_v50  ;;  %v2145_v39 = vmul.f32 %v1823_v5, %v367_v47  ;;  %v857_v4 = vadd.f32 %v1842_v23, %v1919_v6 }
  0xb7   : > { %3505 = vst [vmem:[#allocation11_spill] sm:$0xff] %v2112_v16  ;;  %v498_v16 = vld [vmem:[%s1809_s22 + $0x638] sm:$0xff]  ;;  %v2154_v46 = vmul.f32 %v1823_v5, %v368_v2  ;;  %v2157_v50 = vmul.f32 %v2103_v48, %v491_v3  ;;  %v2160_v47 = vmul.f32 %v2103_v48, %v492_v8  ;;  %v858_v6 = vadd.f32 %v1842_v23, %v1922_v7  ;;  %v509_v5 = vld [vmem:[%s1809_s22 + $0x690] sm:$0xff] }
  0xb8   : > { %3506 = vst [vmem:[#allocation12_spill] sm:$0xff] %v2115_v17  ;;  %v497_v17 = vld [vmem:[%s1809_s22 + $0x630] sm:$0xff]  ;;  %v2169_v2 = vmul.f32 %v2103_v48, %v493_v49  ;;  %v2172_v3 = vmul.f32 %v2103_v48, %v494_v59  ;;  %v2175_v8 = vmul.f32 %v2103_v48, %v495_v58  ;;  %v859_v7 = vadd.f32 %v1842_v23, %v1930_v12 }
  0xb9   : > { %3507 = vst [vmem:[#allocation13_spill] sm:$0xff] %v2127_v26  ;;  %v501_v26 = vld [vmem:[%s1809_s22 + $0x650] sm:$0xff]  ;;  %v2184_v49 = vmul.f32 %v2103_v48, %v496_v54  ;;  %v2187_v59 = vmul.f32 %v2103_v48, %v497_v17  ;;  %v2190_v58 = vmul.f32 %v2103_v48, %v498_v16  ;;  %v860_v12 = vadd.f32 %v1842_v23, %v1933_v13 }
  0xba   : > { %3508 = vst [vmem:[#allocation14_spill] sm:$0xff] %v2130_v30  ;;  %v500_v30 = vld [vmem:[%s1809_s22 + $0x648] sm:$0xff]  ;;  %v2205_v16 = vmul.f32 %v2103_v48, %v501_v26  ;;  %v861_v13 = vadd.f32 %v1842_v23, %v1936_v14  ;;  %v862_v14 = vadd.f32 %v1842_v23, %v1944_v19  ;;  %v863_v19 = vadd.f32 %v1842_v23, %v1947_v20 }
  0xbb   : > { %1108 = vst [vmem:[%s1881_s8 + $0x88] sm:$0xff] %v852_v55  ;;  %v499_v55 = vld [vmem:[%s1809_s22 + $0x640] sm:$0xff]  ;;  %v2202_v17 = vmul.f32 %v2103_v48, %v500_v30  ;;  %v864_v20 = vadd.f32 %v1842_v23, %v1950_v21  ;;  %v865_v21 = vadd.f32 %v1842_v23, %v1958_v27  ;;  %v866_v27 = vadd.f32 %v1842_v23, %v1961_v28 }
  0xbc   : > { %3509 = vst [vmem:[#allocation15_spill] sm:$0xff] %v2139_v37  ;;  %v507_v37 = vld [vmem:[%s1809_s22 + $0x680] sm:$0xff]  ;;  %v2199_v54 = vmul.f32 %v2103_v48, %v499_v55  ;;  %v867_v28 = vadd.f32 %v1842_v23, %v1964_v29  ;;  %v868_v29 = vadd.f32 %v1842_v23, %v1972_v34  ;;  %v869_v34 = vadd.f32 %v1842_v23, %v1975_v35 }
  0xbd   : > { %3510 = vst [vmem:[#allocation16_spill] sm:$0xff] %v2142_v38  ;;  %v504_v38 = vld [vmem:[%s1809_s22 + $0x668] sm:$0xff]  ;;  %v870_v35 = vadd.f32 %v1842_v23, %v1978_v36  ;;  %v871_v36 = vadd.f32 %v1842_v23, %v1987_v41  ;;  %v872_v41 = vadd.f32 %v1842_v23, %v1990_v43  ;;  %v873_v43 = vadd.f32 %v1842_v23, %v1993_v44  ;;  %v550_v44 = vld [vmem:[%s1809_s22 + $0x7d8] sm:$0xff] }
  0xbe   : > { %3511 = vst [vmem:[#allocation17_spill] sm:$0xff] %v2145_v39  ;;  %v503_v39 = vld [vmem:[%s1809_s22 + $0x660] sm:$0xff]  ;;  %v2220_v26 = vmul.f32 %v2103_v48, %v504_v38  ;;  %v2235_v38 = vmul.f32 %v2103_v48, %v507_v37 }
  0xbf   : > { %1109 = vst [vmem:[%s1881_s8 + $0x90] sm:$0xff] %v853_v56  ;;  %v502_v56 = vld [vmem:[%s1809_s22 + $0x658] sm:$0xff]  ;;  %v2217_v30 = vmul.f32 %v2103_v48, %v503_v39 }
  0xc0   : > { %3512 = vst [vmem:[#allocation18_spill] sm:$0xff] %v2154_v46  ;;  %v506_v46 = vld [vmem:[%s1809_s22 + $0x678] sm:$0xff]  ;;  %v2214_v55 = vmul.f32 %v2103_v48, %v502_v56 }
  0xc1   : > { %1110 = vst [vmem:[%s1881_s8 + $0x98] sm:$0xff] %v854_v61  ;;  %v505_v61 = vld [vmem:[%s1809_s22 + $0x670] sm:$0xff]  ;;  %v2232_v39 = vmul.f32 %v2103_v48, %v506_v46  ;;  %v2247_v46 = vmul.f32 %v2103_v48, %v509_v5 }
  0xc2   : > { %3513 = vst [vmem:[#allocation19_spill] sm:$0xff] %v2175_v8  ;;  %v510_v8 = vld [vmem:[%s1809_s22 + $0x698] sm:$0xff]  ;;  %v2229_v56 = vmul.f32 %v2103_v48, %v505_v61 }
  0xc3   : > { %1111 = vst [vmem:[%s1881_s8 + $0xa0] sm:$0xff] %v855_v62  ;;  %v508_v62 = vld [vmem:[%s1809_s22 + $0x688] sm:$0xff]  ;;  %v2250_v37 = vmul.f32 %v2103_v48, %v510_v8 }
  0xc4   : > { %3514 = vst [vmem:[#allocation20_spill] sm:$0xff] %v2187_v59  ;;  %v513_v59 = vld [vmem:[%s1809_s22 + $0x6b0] sm:$0xff]  ;;  %v2244_v61 = vmul.f32 %v2103_v48, %v508_v62 }
  0xc5   : > { %3515 = vst [vmem:[#allocation21_spill] sm:$0xff] %v2190_v58  ;;  %v512_v58 = vld [vmem:[%s1809_s22 + $0x6a8] sm:$0xff]  ;;  %v2265_v8 = vmul.f32 %v2103_v48, %v513_v59 }
  0xc6   : > { %1112 = vst [vmem:[%s1881_s8 + $0xa8] sm:$0xff] %v856_v63  ;;  %v511_v63 = vld [vmem:[%s1809_s22 + $0x6a0] sm:$0xff]  ;;  %v2262_v5 = vmul.f32 %v2103_v48, %v512_v58 }
  0xc7   : > { %3516 = vst [vmem:[#allocation22_spill] sm:$0xff] %v2202_v17  ;;  %v516_v17 = vld [vmem:[%s1809_s22 + $0x6c8] sm:$0xff]  ;;  %v2259_v62 = vmul.f32 %v2103_v48, %v511_v63 }
  0xc8   : > { %3517 = vst [vmem:[#allocation23_spill] sm:$0xff] %v2205_v16  ;;  %v515_v16 = vld [vmem:[%s1809_s22 + $0x6c0] sm:$0xff]  ;;  %v2280_v59 = vmul.f32 %v2103_v48, %v516_v17 }
  0xc9   : > { %1113 = vst [vmem:[%s1881_s8 + $0xb0] sm:$0xff] %v857_v4  ;;  %v514_v4 = vld [vmem:[%s1809_s22 + $0x6b8] sm:$0xff]  ;;  %v2277_v58 = vmul.f32 %v2103_v48, %v515_v16 }
  0xca   : > { %3518 = vst [vmem:[#allocation24_spill] sm:$0xff] %v2217_v30  ;;  %v519_v30 = vld [vmem:[%s1809_s22 + $0x6e0] sm:$0xff]  ;;  %v2274_v63 = vmul.f32 %v2103_v48, %v514_v4 }
  0xcb   : > { %3519 = vst [vmem:[#allocation25_spill] sm:$0xff] %v2220_v26  ;;  %v518_v26 = vld [vmem:[%s1809_s22 + $0x6d8] sm:$0xff]  ;;  %v2295_v17 = vmul.f32 %v2103_v48, %v519_v30 }
  0xcc   : > { %1114 = vst [vmem:[%s1881_s8 + $0xb8] sm:$0xff] %v858_v6  ;;  %v517_v6 = vld [vmem:[%s1809_s22 + $0x6d0] sm:$0xff]  ;;  %v2292_v16 = vmul.f32 %v2103_v48, %v518_v26 }
  0xcd   : > { %3520 = vst [vmem:[#allocation26_spill] sm:$0xff] %v2232_v39  ;;  %v522_v39 = vld [vmem:[%s1809_s22 + $0x6f8] sm:$0xff]  ;;  %v2289_v4 = vmul.f32 %v2103_v48, %v517_v6 }
  0xce   : > { %3521 = vst [vmem:[#allocation27_spill] sm:$0xff] %v2235_v38  ;;  %v521_v38 = vld [vmem:[%s1809_s22 + $0x6f0] sm:$0xff]  ;;  %v2310_v30 = vmul.f32 %v2103_v48, %v522_v39 }
  0xcf   : > { %1115 = vst [vmem:[%s1881_s8 + $0xc0] sm:$0xff] %v859_v7  ;;  %v520_v7 = vld [vmem:[%s1809_s22 + $0x6e8] sm:$0xff]  ;;  %v2307_v26 = vmul.f32 %v2103_v48, %v521_v38 }
  0xd0   : > { %3522 = vst [vmem:[#allocation28_spill] sm:$0xff] %v2247_v46  ;;  %v525_v46 = vld [vmem:[%s1809_s22 + $0x710] sm:$0xff]  ;;  %v2304_v6 = vmul.f32 %v2103_v48, %v520_v7 }
  0xd1   : > { %3523 = vst [vmem:[#allocation29_spill] sm:$0xff] %v2250_v37  ;;  %v524_v37 = vld [vmem:[%s1809_s22 + $0x708] sm:$0xff]  ;;  %v2325_v39 = vmul.f32 %v2103_v48, %v525_v46 }
  0xd2   : > { %1116 = vst [vmem:[%s1881_s8 + $0xc8] sm:$0xff] %v860_v12  ;;  %v523_v12 = vld [vmem:[%s1809_s22 + $0x700] sm:$0xff]  ;;  %v2322_v38 = vmul.f32 %v2103_v48, %v524_v37 }
  0xd3   : > { %3524 = vst [vmem:[#allocation30_spill] sm:$0xff] %v2262_v5  ;;  %v528_v5 = vld [vmem:[%s1809_s22 + $0x728] sm:$0xff]  ;;  %v2319_v7 = vmul.f32 %v2103_v48, %v523_v12 }
  0xd4   : > { %3525 = vst [vmem:[#allocation31_spill] sm:$0xff] %v2265_v8  ;;  %v527_v8 = vld [vmem:[%s1809_s22 + $0x720] sm:$0xff]  ;;  %v2340_v46 = vmul.f32 %v2103_v48, %v528_v5 }
  0xd5   : > { %1117 = vst [vmem:[%s1881_s8 + $0xd0] sm:$0xff] %v861_v13  ;;  %v526_v13 = vld [vmem:[%s1809_s22 + $0x718] sm:$0xff]  ;;  %v2337_v37 = vmul.f32 %v2103_v48, %v527_v8 }
  0xd6   : > { %3526 = vst [vmem:[#allocation32_spill] sm:$0xff] %v2277_v58  ;;  %v531_v58 = vld [vmem:[%s1809_s22 + $0x740] sm:$0xff]  ;;  %v2334_v12 = vmul.f32 %v2103_v48, %v526_v13 }
  0xd7   : > { %3527 = vst [vmem:[#allocation33_spill] sm:$0xff] %v2280_v59  ;;  %v530_v59 = vld [vmem:[%s1809_s22 + $0x738] sm:$0xff]  ;;  %v2355_v5 = vmul.f32 %v2103_v48, %v531_v58 }
  0xd8   : > { %1118 = vst [vmem:[%s1881_s8 + $0xd8] sm:$0xff] %v862_v14  ;;  %v529_v14 = vld [vmem:[%s1809_s22 + $0x730] sm:$0xff]  ;;  %v2352_v8 = vmul.f32 %v2103_v48, %v530_v59 }
  0xd9   : > { %3528 = vst [vmem:[#allocation34_spill] sm:$0xff] %v2292_v16  ;;  %v534_v16 = vld [vmem:[%s1809_s22 + $0x758] sm:$0xff]  ;;  %v2349_v13 = vmul.f32 %v2103_v48, %v529_v14 }
  0xda   : > { %3529 = vst [vmem:[#allocation35_spill] sm:$0xff] %v2295_v17  ;;  %v533_v17 = vld [vmem:[%s1809_s22 + $0x750] sm:$0xff]  ;;  %v2370_v58 = vmul.f32 %v2103_v48, %v534_v16 }
  0xdb   : > { %1119 = vst [vmem:[%s1881_s8 + $0xe0] sm:$0xff] %v863_v19  ;;  %v532_v19 = vld [vmem:[%s1809_s22 + $0x748] sm:$0xff]  ;;  %v2367_v59 = vmul.f32 %v2103_v48, %v533_v17 }
  0xdc   : > { %3530 = vst [vmem:[#allocation36_spill] sm:$0xff] %v2307_v26  ;;  %v537_v26 = vld [vmem:[%s1809_s22 + $0x770] sm:$0xff]  ;;  %v2364_v14 = vmul.f32 %v2103_v48, %v532_v19 }
  0xdd   : > { %3531 = vst [vmem:[#allocation37_spill] sm:$0xff] %v2310_v30  ;;  %v536_v30 = vld [vmem:[%s1809_s22 + $0x768] sm:$0xff]  ;;  %v2385_v16 = vmul.f32 %v2103_v48, %v537_v26  ;;  %v874_v26 = vadd.f32 %v1842_v23, %v2002_v51  ;;  %v553_v51 = vld [vmem:[%s1809_s22 + $0x7f0] sm:$0xff] }
  0xde   : > { %1120 = vst [vmem:[%s1881_s8 + $0xe8] sm:$0xff] %v864_v20  ;;  %v535_v20 = vld [vmem:[%s1809_s22 + $0x760] sm:$0xff]  ;;  %v2382_v17 = vmul.f32 %v2103_v48, %v536_v30 }
  0xdf   : > { %3532 = vst [vmem:[#allocation38_spill] sm:$0xff] %v2322_v38  ;;  %v540_v38 = vld [vmem:[%s1809_s22 + $0x788] sm:$0xff]  ;;  %v2379_v19 = vmul.f32 %v2103_v48, %v535_v20 }
  0xe0   : > { %3533 = vst [vmem:[#allocation39_spill] sm:$0xff] %v2325_v39  ;;  %v539_v39 = vld [vmem:[%s1809_s22 + $0x780] sm:$0xff]  ;;  %v2400_v30 = vmul.f32 %v2103_v48, %v540_v38  ;;  %v875_v38 = vadd.f32 %v1842_v23, %v2005_v52 }
  0xe1   : > { %1121 = vst [vmem:[%s1881_s8 + $0xf0] sm:$0xff] %v865_v21  ;;  %v538_v21 = vld [vmem:[%s1809_s22 + $0x778] sm:$0xff]  ;;  %v2397_v20 = vmul.f32 %v2103_v48, %v539_v39 }
  0xe2   : > { %3534 = vst [vmem:[#allocation40_spill] sm:$0xff] %v2337_v37  ;;  %v543_v37 = vld [vmem:[%s1809_s22 + $0x7a0] sm:$0xff] }
  0xe3   : > { %3535 = vst [vmem:[#allocation41_spill] sm:$0xff] %v2340_v46  ;;  %v542_v46 = vld [vmem:[%s1809_s22 + $0x798] sm:$0xff]  ;;  %v2415_v39 = vmul.f32 %v2103_v48, %v543_v37  ;;  %v876_v37 = vadd.f32 %v1842_v23, %v2008_v53 }
  0xe4   : > { %1122 = vst [vmem:[%s1881_s8 + $0xf8] sm:$0xff] %v866_v27  ;;  %v541_v27 = vld [vmem:[%s1809_s22 + $0x790] sm:$0xff] }
  0xe5   : > { %3536 = vst [vmem:[#allocation42_spill] sm:$0xff] %v2352_v8  ;;  %v546_v8 = vld [vmem:[%s1809_s22 + $0x7b8] sm:$0xff] }
  0xe6   : > { %3537 = vst [vmem:[#allocation43_spill] sm:$0xff] %v2355_v5  ;;  %v545_v5 = vld [vmem:[%s1809_s22 + $0x7b0] sm:$0xff] }
  0xe7   : > { %1123 = vst [vmem:[%s1881_s8 + $0x100] sm:$0xff] %v867_v28  ;;  %v544_v28 = vld [vmem:[%s1809_s22 + $0x7a8] sm:$0xff] }
  0xe8   : > { %3538 = vst [vmem:[#allocation44_spill] sm:$0xff] %v2364_v14  ;;  %v2394_v14 = vmul.f32 %v2103_v48, %v538_v21  ;;  %v2412_v21 = vmul.f32 %v2103_v48, %v542_v46 }
  0xe9   : > { %3539 = vst [vmem:[#allocation45_spill] sm:$0xff] %v2367_v59  ;;  %v549_v59 = vld [vmem:[%s1809_s22 + $0x7d0] sm:$0xff] }
  0xea   : > { %3540 = vst [vmem:[#allocation46_spill] sm:$0xff] %v2370_v58  ;;  %v548_v58 = vld [vmem:[%s1809_s22 + $0x7c8] sm:$0xff] }
  0xeb   : > { %1124 = vst [vmem:[%s1881_s8 + $0x108] sm:$0xff] %v868_v29  ;;  %v547_v29 = vld [vmem:[%s1809_s22 + $0x7c0] sm:$0xff]  ;;  %v2438_v46 = vmul.f32 %v2103_v48, %v548_v58  ;;  %v878_v58 = vadd.f32 %v1842_v23, %v2020_v0  ;;  %v882_v0 = vadd.f32 %v1842_v23, %v2038_v11  ;;  %v888_v11 = vadd.f32 %v1842_v23, %v2068_v33 }
  0xec   : > { %3541 = vst [vmem:[#allocation47_spill] sm:$0xff] %v2382_v17  ;;  %v2409_v17 = vmul.f32 %v2103_v48, %v541_v27  ;;  %v2426_v27 = vmul.f32 %v2103_v48, %v545_v5  ;;  %v2435_v52 = vmul.f32 %v2103_v48, %v547_v29  ;;  %v877_v5 = vadd.f32 %v1842_v23, %v2017_v60 }
  0xed   : > { %3542 = vst [vmem:[#allocation48_spill] sm:$0xff] %v2385_v16  ;;  %v552_v16 = vld [vmem:[%s1809_s22 + $0x7e8] sm:$0xff]  ;;  %v883_v29 = vadd.f32 %v1842_v23, %v2047_v18  ;;  %v889_v18 = vadd.f32 %v1842_v23, %v2077_v40 }
  0xee   : > { %1125 = vst [vmem:[%s1881_s8 + $0x110] sm:$0xff] %v869_v34  ;;  %v551_v34 = vld [vmem:[%s1809_s22 + $0x7e0] sm:$0xff] }
  0xef   : > { %3543 = vst [vmem:[#allocation49_spill] sm:$0xff] %v2400_v30  ;;  %v2423_v30 = vmul.f32 %v2103_v48, %v544_v28  ;;  %v2450_v53 = vmul.f32 %v2103_v48, %v551_v34  ;;  %v879_v28 = vadd.f32 %v1842_v23, %v2023_v1  ;;  %v885_v1 = vadd.f32 %v1842_v23, %v2053_v24 }
  0xf0   : > { %1126 = vst [vmem:[%s1881_s8 + $0x118] sm:$0xff] %v870_v35  ;;  %v554_v35 = vld [vmem:[%s1809_s22 + $0x7f8] sm:$0xff]  ;;  %v2495_v24 = vadd.f32 %v1842_v23, %v2083_v45 }
  0xf1   : > { %3544 = vst [vmem:[#allocation50_spill] sm:$0xff] %v2409_v17  ;;  %v2429_v17 = vmul.f32 %v2103_v48, %v546_v8  ;;  %v2447_v8 = vmul.f32 %v2103_v48, %v550_v44  ;;  %v2462_v60 = vmul.f32 %v2103_v48, %v554_v35  ;;  %v3546_v44 = vld [vmem:[#allocation10_spill] sm:$0xff]  ;;  %v3547_v45 = vld [vmem:[#allocation11_spill] sm:$0xff]  ;;  %v2527_v35 = vadd.f32 %v1842_v23, %v2124_v25 }
  0xf2   : > { %1127 = vst [vmem:[%s1881_s8 + $0x120] sm:$0xff] %v871_v36  ;;  %v2441_v36 = vmul.f32 %v2103_v48, %v549_v59  ;;  %v2459_v59 = vmul.f32 %v2103_v48, %v553_v51  ;;  %v2508_v40 = vadd.f32 %v1842_v23, %v3546_v44  ;;  %v2516_v34 = vadd.f32 %v1842_v23, %v3547_v45  ;;  %v3551_v45 = vld [vmem:[#allocation19_spill] sm:$0xff] }
  0xf3   : > { %1128 = vst [vmem:[%s1881_s8 + $0x128] sm:$0xff] %v872_v41  ;;  %v2453_v41 = vmul.f32 %v2103_v48, %v552_v16  ;;  %v881_v16 = vadd.f32 %v1842_v23, %v2035_v10  ;;  %v887_v10 = vadd.f32 %v1842_v23, %v2065_v32  ;;  %v3545_v32 = vld [vmem:[#allocation9_spill] sm:$0xff] }
  0xf4   : > { %1129 = vst [vmem:[%s1881_s8 + $0x130] sm:$0xff] %v873_v43  ;;  %v880_v43 = vadd.f32 %v1842_v23, %v2032_v9  ;;  %v886_v9 = vadd.f32 %v1842_v23, %v2062_v31  ;;  %v2499_v31 = vadd.f32 %v1842_v23, %v2092_v57  ;;  %v2504_v33 = vadd.f32 %v1842_v23, %v3545_v32  ;;  %v2519_v57 = vpop.permute.xlu1 %832 }
  0xf5   : > { %1130 = vst [vmem:[%s1881_s8 + $0x138] sm:$0xff] %v874_v26  ;;  %v884_v26 = vadd.f32 %v1842_v23, %v2050_v22  ;;  %v2491_v22 = vadd.f32 %v1842_v23, %v2080_v42  ;;  %v2512_v42 = vadd.f32 %v1842_v23, %v2109_v15  ;;  %v2544_v32 = vadd.f32 %v2519_v57, %v2160_v47  ;;  %v3552_v47 = vld [vmem:[#allocation20_spill] sm:$0xff] }
  0xf6   : > { %1131 = vst [vmem:[%s1881_s8 + $0x140] sm:$0xff] %v875_v38  ;;  %v3548_v38 = vld [vmem:[#allocation12_spill] sm:$0xff]  ;;  %v2548_v25 = vadd.f32 %v2519_v57, %v2169_v2  ;;  %v2552_v44 = vadd.f32 %v2519_v57, %v2172_v3  ;;  %v3553_v2 = vld [vmem:[#allocation21_spill] sm:$0xff]  ;;  %v2574_v3 = vadd.f32 %v2519_v57, %v2199_v54 }
  0xf7   : > { %1132 = vst [vmem:[%s1881_s8 + $0x148] sm:$0xff] %v876_v37  ;;  %v2523_v51 = vadd.f32 %v1842_v23, %v3548_v38  ;;  %v3549_v37 = vld [vmem:[#allocation13_spill] sm:$0xff]  ;;  %v2565_v38 = vadd.f32 %v2519_v57, %v3552_v47  ;;  %v2586_v47 = vadd.f32 %v2519_v57, %v2214_v55  ;;  %v3563_v55 = vld [vmem:[#allocation27_spill] sm:$0xff] }
  0xf8   : > { %1133 = vst [vmem:[%s1881_s8 + $0x150] sm:$0xff] %v877_v5  ;;  %v2531_v15 = vadd.f32 %v1842_v23, %v3549_v37  ;;  %v3550_v5 = vld [vmem:[#allocation14_spill] sm:$0xff]  ;;  %v2569_v37 = vadd.f32 %v2519_v57, %v3553_v2  ;;  %v3558_v2 = vld [vmem:[#allocation24_spill] sm:$0xff]  ;;  %v3559_v54 = vld [vmem:[#allocation25_spill] sm:$0xff] }
  0xf9   : > { %1134 = vst [vmem:[%s1881_s8 + $0x158] sm:$0xff] %v878_v58  ;;  %v2535_v58 = vadd.f32 %v1842_v23, %v3550_v5 }
  0xfa   : > { %1135 = vst [vmem:[%s1881_s8 + $0x160] sm:$0xff] %v879_v28  ;;  %v2540_v28 = vadd.f32 %v2519_v57, %v2157_v50  ;;  %v2561_v50 = vadd.f32 %v2519_v57, %v2184_v49  ;;  %v3556_v49 = vld [vmem:[#allocation23_spill] sm:$0xff] }
  0xfb   : > { %1136 = vst [vmem:[%s1881_s8 + $0x168] sm:$0xff] %v880_v43  ;;  %v2557_v43 = vadd.f32 %v2519_v57, %v3551_v45  ;;  %v2582_v45 = vadd.f32 %v2519_v57, %v3556_v49  ;;  %v3562_v49 = vld [vmem:[#allocation26_spill] sm:$0xff] }
  0xfc   : > { %1137 = vst [vmem:[%s1881_s8 + $0x170] sm:$0xff] %v881_v16  ;;  %v3555_v16 = vld [vmem:[#allocation22_spill] sm:$0xff] }
  0xfd   : > { %1138 = vst [vmem:[%s1881_s8 + $0x178] sm:$0xff] %v882_v0  ;;  %v2578_v5 = vadd.f32 %v2519_v57, %v3555_v16  ;;  %v2591_v0 = vadd.f32 %v2519_v57, %v3558_v2  ;;  %v2599_v16 = vadd.f32 %v2519_v57, %v2229_v56  ;;  %v2612_v2 = vadd.f32 %v2519_v57, %v2244_v61  ;;  %v3566_v56 = vld [vmem:[#allocation29_spill] sm:$0xff]  ;;  %v3569_v61 = vld [vmem:[#allocation31_spill] sm:$0xff] }
  0xfe   : > { %3554 = vst [vmem:[#allocation9_spill] sm:$0xff] %v2574_v3  ;;  %v2595_v3 = vadd.f32 %v2519_v57, %v3559_v54  ;;  %v3565_v54 = vld [vmem:[#allocation28_spill] sm:$0xff] }
  0xff   : > { %3557 = vst [vmem:[#allocation10_spill] sm:$0xff] %v2582_v45  ;;  %v2603_v45 = vadd.f32 %v2519_v57, %v3562_v49  ;;  %v3568_v49 = vld [vmem:[#allocation30_spill] sm:$0xff] }
 0x100   : > { %1139 = vst [vmem:[%s1881_s8 + $0x180] sm:$0xff] %v883_v29  ;;  %v2608_v29 = vadd.f32 %v2519_v57, %v3563_v55  ;;  %v2629_v55 = vadd.f32 %v2519_v57, %v3568_v49  ;;  %v2650_v49 = vadd.f32 %v2519_v57, %v2289_v4  ;;  %v3579_v4 = vld [vmem:[#allocation37_spill] sm:$0xff] }
 0x101   : > { %3560 = vst [vmem:[#allocation11_spill] sm:$0xff] %v2595_v3  ;;  %v2616_v3 = vadd.f32 %v2519_v57, %v3565_v54  ;;  %v2637_v54 = vadd.f32 %v2519_v57, %v2274_v63  ;;  %v3576_v63 = vld [vmem:[#allocation35_spill] sm:$0xff] }
 0x102   : > { %3561 = vst [vmem:[#allocation12_spill] sm:$0xff] %v2599_v16  ;;  %v2620_v16 = vadd.f32 %v2519_v57, %v3566_v56  ;;  %v3571_v56 = vld [vmem:[#allocation32_spill] sm:$0xff] }
 0x103   : > { %1140 = vst [vmem:[%s1881_s8 + $0x188] sm:$0xff] %v884_v26  ;;  %v2625_v26 = vadd.f32 %v2519_v57, %v2259_v62  ;;  %v3572_v62 = vld [vmem:[#allocation33_spill] sm:$0xff] }
 0x104   : > { %3564 = vst [vmem:[#allocation13_spill] sm:$0xff] %v2612_v2  ;;  %v2633_v2 = vadd.f32 %v2519_v57, %v3569_v61  ;;  %v3575_v61 = vld [vmem:[#allocation34_spill] sm:$0xff] }
 0x105   : > { %1141 = vst [vmem:[%s1881_s8 + $0x190] sm:$0xff] %v885_v1  ;;  %v2642_v1 = vadd.f32 %v2519_v57, %v3571_v56  ;;  %v2663_v56 = vadd.f32 %v2519_v57, %v2304_v6  ;;  %v3582_v6 = vld [vmem:[#allocation39_spill] sm:$0xff] }
 0x106   : > { %3567 = vst [vmem:[#allocation14_spill] sm:$0xff] %v2625_v26  ;;  %v2646_v26 = vadd.f32 %v2519_v57, %v3572_v62  ;;  %v3578_v62 = vld [vmem:[#allocation36_spill] sm:$0xff] }
 0x107   : > { %3570 = vst [vmem:[#allocation19_spill] sm:$0xff] %v2633_v2  ;;  %v2654_v2 = vadd.f32 %v2519_v57, %v3575_v61  ;;  %v3581_v61 = vld [vmem:[#allocation38_spill] sm:$0xff] }
 0x108   : > { %1142 = vst [vmem:[%s1881_s8 + $0x198] sm:$0xff] %v886_v9  ;;  %v2659_v9 = vadd.f32 %v2519_v57, %v3576_v63  ;;  %v2680_v63 = vadd.f32 %v2519_v57, %v3581_v61  ;;  %v2701_v61 = vadd.f32 %v2519_v57, %v2349_v13 }
 0x109   : > { %3573 = vst [vmem:[#allocation20_spill] sm:$0xff] %v2646_v26  ;;  %v2667_v26 = vadd.f32 %v2519_v57, %v3578_v62  ;;  %v2688_v62 = vadd.f32 %v2519_v57, %v2334_v12  ;;  %v3589_v12 = vld [vmem:[#allocation43_spill] sm:$0xff] }
 0x10a   : > { %3574 = vst [vmem:[#allocation21_spill] sm:$0xff] %v2650_v49  ;;  %v2671_v49 = vadd.f32 %v2519_v57, %v3579_v4  ;;  %v3584_v4 = vld [vmem:[#allocation40_spill] sm:$0xff] }
 0x10b   : > { %1143 = vst [vmem:[%s1881_s8 + $0x1a0] sm:$0xff] %v887_v10  ;;  %v2676_v10 = vadd.f32 %v2519_v57, %v2319_v7  ;;  %v3585_v7 = vld [vmem:[#allocation41_spill] sm:$0xff] }
 0x10c   : > { %3577 = vst [vmem:[#allocation22_spill] sm:$0xff] %v2663_v56  ;;  %v2684_v56 = vadd.f32 %v2519_v57, %v3582_v6  ;;  %v3588_v6 = vld [vmem:[#allocation42_spill] sm:$0xff] }
 0x10d   : > { %1144 = vst [vmem:[%s1881_s8 + $0x1a8] sm:$0xff] %v888_v11  ;;  %v2693_v11 = vadd.f32 %v2519_v57, %v3584_v4  ;;  %v3590_v4 = vld [vmem:[#allocation44_spill] sm:$0xff] }
 0x10e   : > { %3580 = vst [vmem:[#allocation23_spill] sm:$0xff] %v2676_v10  ;;  %v2697_v10 = vadd.f32 %v2519_v57, %v3585_v7  ;;  %v2715_v7 = vadd.f32 %v2519_v57, %v3590_v4 }
 0x10f   : > { %3583 = vst [vmem:[#allocation24_spill] sm:$0xff] %v2684_v56  ;;  %v2705_v56 = vadd.f32 %v2519_v57, %v3588_v6 }
 0x110   : > { %1145 = vst [vmem:[%s1881_s8 + $0x1b0] sm:$0xff] %v889_v18  ;;  %v2711_v18 = vadd.f32 %v2519_v57, %v3589_v12  ;;  %v3595_v12 = vld [vmem:[#allocation47_spill] sm:$0xff] }
 0x111   : > { %3586 = vst [vmem:[#allocation25_spill] sm:$0xff] %v2697_v10  ;;  %v3592_v10 = vld [vmem:[#allocation45_spill] sm:$0xff]  ;;  %v2733_v4 = vadd.f32 %v2519_v57, %v3595_v12  ;;  %v3598_v12 = vld [vmem:[#allocation50_spill] sm:$0xff] }
 0x112   : > { %3587 = vst [vmem:[#allocation26_spill] sm:$0xff] %v2701_v61  ;;  %v2719_v13 = vadd.f32 %v2519_v57, %v3592_v10  ;;  %v3593_v61 = vld [vmem:[#allocation46_spill] sm:$0xff] }
 0x113   : > { %1146 = vst [vmem:[%s1881_s8 + $0x1b8] sm:$0xff] %v2491_v22  ;;  %v2723_v6 = vadd.f32 %v2519_v57, %v3593_v61  ;;  %v2729_v22 = vadd.f32 %v2519_v57, %v2379_v19  ;;  %v2741_v61 = vadd.f32 %v2519_v57, %v2394_v14  ;;  %v3597_v19 = vld [vmem:[#allocation49_spill] sm:$0xff]  ;;  %v2759_v14 = vadd.f32 %v2519_v57, %v2412_v21 }
 0x114   : > { %3591 = vst [vmem:[#allocation27_spill] sm:$0xff] %v2715_v7  ;;  %v3596_v7 = vld [vmem:[#allocation48_spill] sm:$0xff]  ;;  %v2778_v21 = vadd.f32 %v2519_v57, %v2429_v17  ;;  %v2797_v17 = vadd.f32 %v2519_v57, %v2447_v8  ;;  %v2816_v8 = vadd.f32 %v2519_v57, %v2462_v60 }
 0x115   : > { %1147 = vst [vmem:[%s1881_s8 + $0x1c0] sm:$0xff] %v2495_v24  ;;  %v2737_v10 = vadd.f32 %v2519_v57, %v3596_v7  ;;  %v2747_v24 = vadd.f32 %v2519_v57, %v2397_v20  ;;  %v2755_v7 = vadd.f32 %v2519_v57, %v3598_v12  ;;  %v2766_v20 = vadd.f32 %v2519_v57, %v2415_v39 }
 0x116   : > { %3594 = vst [vmem:[#allocation28_spill] sm:$0xff] %v2729_v22  ;;  %v2751_v22 = vadd.f32 %v2519_v57, %v3597_v19  ;;  %v2770_v19 = vadd.f32 %v2519_v57, %v2423_v30  ;;  %v2774_v12 = vadd.f32 %v2519_v57, %v2426_v27  ;;  %v2785_v39 = vadd.f32 %v2519_v57, %v2435_v52 }
 0x117   : > { %1148 = vst [vmem:[%s1881_s8 + $0x1c8] sm:$0xff] %v2499_v31  ;;  %v369_v31 = vld [vmem:[%s1809_s22 + $0x230] sm:$0xff]  ;;  %v2789_v30 = vadd.f32 %v2519_v57, %v2438_v46  ;;  %v2793_v27 = vadd.f32 %v2519_v57, %v2441_v36  ;;  %v2804_v52 = vadd.f32 %v2519_v57, %v2450_v53  ;;  %v2808_v46 = vadd.f32 %v2519_v57, %v2453_v41  ;;  %v3607_v53 = vld [vmem:[#allocation8_spill] sm:$0xff] }
 0x118   : > { %1149 = vst [vmem:[%s1881_s8 + $0x1d0] sm:$0xff] %v2504_v33  ;;  %v370_v33 = vld [vmem:[%s1809_s22 + $0x238] sm:$0xff]  ;;  %v2812_v36 = vadd.f32 %v2519_v57, %v2459_v59 }
 0x119   : > { %1150 = vst [vmem:[%s1881_s8 + $0x1d8] sm:$0xff] %v2508_v40  ;;  %v371_v40 = vld [vmem:[%s1809_s22 + $0x240] sm:$0xff]  ;;  %v638_v59 = vmul.f32 %v3607_v53, %v370_v33 }
 0x11a   : > { %3599 = vst [vmem:[#allocation29_spill] sm:$0xff] %v2785_v39 }
 0x11b   : > { %3600 = vst [vmem:[#allocation30_spill] sm:$0xff] %v2789_v30 }
 0x11c   : > { %3601 = vst [vmem:[#allocation31_spill] sm:$0xff] %v2793_v27  ;;  %v3611_v27 = vld [vmem:[#allocation18_spill] sm:$0xff] }
 0x11d   : > { %3602 = vst [vmem:[#allocation32_spill] sm:$0xff] %v2797_v17  ;;  %v3608_v17 = vld [vmem:[#allocation15_spill] sm:$0xff] }
 0x11e   : > { %1151 = vst [vmem:[%s1881_s8 + $0x1e0] sm:$0xff] %v2512_v42  ;;  %v372_v42 = vld [vmem:[%s1809_s22 + $0x248] sm:$0xff]  ;;  %v901_v41 = vadd.f32 %v1842_v23, %v3608_v17 }
 0x11f   : > { %3603 = vst [vmem:[#allocation33_spill] sm:$0xff] %v2804_v52  ;;  %v637_v52 = vmul.f32 %v3607_v53, %v369_v31  ;;  %v639_v31 = vmul.f32 %v3607_v53, %v371_v40  ;;  %v640_v33 = vmul.f32 %v3607_v53, %v372_v42  ;;  %v906_v42 = vadd.f32 %v1842_v23, %v638_v59 }
 0x120   : > { %3604 = vst [vmem:[#allocation34_spill] sm:$0xff] %v2808_v46  ;;  %v373_v46 = vld [vmem:[%s1809_s22 + $0x250] sm:$0xff] }
 0x121   : > { %3605 = vst [vmem:[#allocation35_spill] sm:$0xff] %v2812_v36  ;;  %v3609_v36 = vld [vmem:[#allocation16_spill] sm:$0xff]  ;;  %v641_v40 = vmul.f32 %v3607_v53, %v373_v46  ;;  %v905_v30 = vadd.f32 %v1842_v23, %v637_v52  ;;  %v907_v39 = vadd.f32 %v1842_v23, %v639_v31 }
 0x122   : > { %3606 = vst [vmem:[#allocation36_spill] sm:$0xff] %v2816_v8  ;;  %v902_v60 = vadd.f32 %v1842_v23, %v3609_v36  ;;  %v3610_v8 = vld [vmem:[#allocation17_spill] sm:$0xff]  ;;  %v904_v36 = vadd.f32 %v1842_v23, %v3611_v27  ;;  %v378_v27 = vld [vmem:[%s1809_s22 + $0x278] sm:$0xff]  ;;  %v379_v46 = vld [vmem:[%s1809_s22 + $0x280] sm:$0xff] }
 0x123   : > { %1152 = vst [vmem:[%s1881_s8 + $0x1e8] sm:$0xff] %v2516_v34  ;;  %v374_v34 = vld [vmem:[%s1809_s22 + $0x258] sm:$0xff]  ;;  %v903_v17 = vadd.f32 %v1842_v23, %v3610_v8  ;;  %v646_v31 = vmul.f32 %v3607_v53, %v378_v27  ;;  %v384_v27 = vld [vmem:[%s1809_s22 + $0x2a8] sm:$0xff] }
 0x124   : > { %1153 = vst [vmem:[%s1881_s8 + $0x1f0] sm:$0xff] %v2523_v51  ;;  %v375_v51 = vld [vmem:[%s1809_s22 + $0x260] sm:$0xff]  ;;  %v642_v8 = vmul.f32 %v3607_v53, %v374_v34  ;;  %v380_v34 = vld [vmem:[%s1809_s22 + $0x288] sm:$0xff] }
 0x125   : > { %1154 = vst [vmem:[%s1881_s8 + $0x1f8] sm:$0xff] %v2527_v35  ;;  %v376_v35 = vld [vmem:[%s1809_s22 + $0x268] sm:$0xff] }
 0x126   : > { %1155 = vst [vmem:[%s1881_s8 + $0x200] sm:$0xff] %v2531_v15  ;;  %v377_v15 = vld [vmem:[%s1809_s22 + $0x270] sm:$0xff]  ;;  %v644_v52 = vmul.f32 %v3607_v53, %v376_v35  ;;  %v382_v35 = vld [vmem:[%s1809_s22 + $0x298] sm:$0xff] }
 0x127   : > { %1156 = vst [vmem:[%s1881_s8 + $0x208] sm:$0xff] %v2535_v58  ;;  %v643_v58 = vmul.f32 %v3607_v53, %v375_v51  ;;  %v645_v59 = vmul.f32 %v3607_v53, %v377_v15  ;;  %v381_v51 = vld [vmem:[%s1809_s22 + $0x290] sm:$0xff]  ;;  %v383_v15 = vld [vmem:[%s1809_s22 + $0x2a0] sm:$0xff] }
 0x128   : > { %1157 = vst [vmem:[%s1881_s8 + $0x210] sm:$0xff] %v901_v41  ;;  %v908_v41 = vadd.f32 %v1842_v23, %v640_v33  ;;  %v647_v33 = vmul.f32 %v3607_v53, %v379_v46  ;;  %v385_v46 = vld [vmem:[%s1809_s22 + $0x2b0] sm:$0xff] }
 0x129   : > { %1158 = vst [vmem:[%s1881_s8 + $0x218] sm:$0xff] %v902_v60  ;;  %v909_v60 = vadd.f32 %v1842_v23, %v641_v40  ;;  %v912_v40 = vadd.f32 %v1842_v23, %v644_v52  ;;  %v651_v52 = vmul.f32 %v3607_v53, %v383_v15  ;;  %v389_v15 = vld [vmem:[%s1809_s22 + $0x2d0] sm:$0xff] }
 0x12a   : > { %1159 = vst [vmem:[%s1881_s8 + $0x220] sm:$0xff] %v903_v17  ;;  %v910_v17 = vadd.f32 %v1842_v23, %v642_v8  ;;  %v649_v8 = vmul.f32 %v3607_v53, %v381_v51  ;;  %v387_v51 = vld [vmem:[%s1809_s22 + $0x2c0] sm:$0xff] }
 0x12b   : > { %1160 = vst [vmem:[%s1881_s8 + $0x228] sm:$0xff] %v904_v36  ;;  %v911_v36 = vadd.f32 %v1842_v23, %v643_v58  ;;  %v914_v58 = vadd.f32 %v1842_v23, %v646_v31  ;;  %v653_v31 = vmul.f32 %v3607_v53, %v385_v46  ;;  %v391_v46 = vld [vmem:[%s1809_s22 + $0x2e0] sm:$0xff] }
 0x12c   : > { %1161 = vst [vmem:[%s1881_s8 + $0x230] sm:$0xff] %v905_v30  ;;  %v648_v30 = vmul.f32 %v3607_v53, %v380_v34  ;;  %v386_v34 = vld [vmem:[%s1809_s22 + $0x2b8] sm:$0xff] }
 0x12d   : > { %1162 = vst [vmem:[%s1881_s8 + $0x238] sm:$0xff] %v906_v42  ;;  %v913_v42 = vadd.f32 %v1842_v23, %v645_v59  ;;  %v652_v59 = vmul.f32 %v3607_v53, %v384_v27  ;;  %v390_v27 = vld [vmem:[%s1809_s22 + $0x2d8] sm:$0xff] }
 0x12e   : > { %1163 = vst [vmem:[%s1881_s8 + $0x240] sm:$0xff] %v907_v39  ;;  %v650_v39 = vmul.f32 %v3607_v53, %v382_v35  ;;  %v388_v35 = vld [vmem:[%s1809_s22 + $0x2c8] sm:$0xff] }
 0x12f   : > { %1164 = vst [vmem:[%s1881_s8 + $0x248] sm:$0xff] %v908_v41  ;;  %v915_v41 = vadd.f32 %v1842_v23, %v647_v33  ;;  %v654_v33 = vmul.f32 %v3607_v53, %v386_v34  ;;  %v392_v34 = vld [vmem:[%s1809_s22 + $0x2e8] sm:$0xff] }
 0x130   : > { %1165 = vst [vmem:[%s1881_s8 + $0x250] sm:$0xff] %v909_v60  ;;  %v916_v60 = vadd.f32 %v1842_v23, %v648_v30  ;;  %v655_v30 = vmul.f32 %v3607_v53, %v387_v51  ;;  %v393_v51 = vld [vmem:[%s1809_s22 + $0x2f0] sm:$0xff] }
 0x131   : > { %1166 = vst [vmem:[%s1881_s8 + $0x258] sm:$0xff] %v910_v17  ;;  %v917_v17 = vadd.f32 %v1842_v23, %v649_v8  ;;  %v656_v8 = vmul.f32 %v3607_v53, %v388_v35  ;;  %v394_v35 = vld [vmem:[%s1809_s22 + $0x2f8] sm:$0xff] }
 0x132   : > { %1167 = vst [vmem:[%s1881_s8 + $0x260] sm:$0xff] %v911_v36  ;;  %v918_v36 = vadd.f32 %v1842_v23, %v650_v39  ;;  %v657_v39 = vmul.f32 %v3607_v53, %v389_v15  ;;  %v395_v15 = vld [vmem:[%s1809_s22 + $0x300] sm:$0xff] }
 0x133   : > { %1168 = vst [vmem:[%s1881_s8 + $0x268] sm:$0xff] %v912_v40  ;;  %v919_v40 = vadd.f32 %v1842_v23, %v651_v52  ;;  %v658_v52 = vmul.f32 %v3607_v53, %v390_v27  ;;  %v396_v27 = vld [vmem:[%s1809_s22 + $0x308] sm:$0xff] }
 0x134   : > { %1169 = vst [vmem:[%s1881_s8 + $0x270] sm:$0xff] %v913_v42  ;;  %v920_v42 = vadd.f32 %v1842_v23, %v652_v59  ;;  %v659_v59 = vmul.f32 %v3607_v53, %v391_v46  ;;  %v397_v46 = vld [vmem:[%s1809_s22 + $0x310] sm:$0xff] }
 0x135   : > { %1170 = vst [vmem:[%s1881_s8 + $0x278] sm:$0xff] %v914_v58  ;;  %v921_v58 = vadd.f32 %v1842_v23, %v653_v31  ;;  %v660_v31 = vmul.f32 %v3607_v53, %v392_v34  ;;  %v398_v34 = vld [vmem:[%s1809_s22 + $0x318] sm:$0xff] }
 0x136   : > { %1171 = vst [vmem:[%s1881_s8 + $0x280] sm:$0xff] %v915_v41  ;;  %v922_v41 = vadd.f32 %v1842_v23, %v654_v33  ;;  %v661_v33 = vmul.f32 %v3607_v53, %v393_v51  ;;  %v399_v51 = vld [vmem:[%s1809_s22 + $0x320] sm:$0xff] }
 0x137   : > { %1172 = vst [vmem:[%s1881_s8 + $0x288] sm:$0xff] %v916_v60  ;;  %v923_v60 = vadd.f32 %v1842_v23, %v655_v30  ;;  %v662_v30 = vmul.f32 %v3607_v53, %v394_v35  ;;  %v400_v35 = vld [vmem:[%s1809_s22 + $0x328] sm:$0xff] }
 0x138   : > { %1173 = vst [vmem:[%s1881_s8 + $0x290] sm:$0xff] %v917_v17  ;;  %v924_v17 = vadd.f32 %v1842_v23, %v656_v8  ;;  %v663_v8 = vmul.f32 %v3607_v53, %v395_v15  ;;  %v401_v15 = vld [vmem:[%s1809_s22 + $0x330] sm:$0xff] }
 0x139   : > { %1174 = vst [vmem:[%s1881_s8 + $0x298] sm:$0xff] %v918_v36  ;;  %v925_v36 = vadd.f32 %v1842_v23, %v657_v39  ;;  %v664_v39 = vmul.f32 %v3607_v53, %v396_v27  ;;  %v402_v27 = vld [vmem:[%s1809_s22 + $0x338] sm:$0xff] }
 0x13a   : > { %1175 = vst [vmem:[%s1881_s8 + $0x2a0] sm:$0xff] %v919_v40  ;;  %v926_v40 = vadd.f32 %v1842_v23, %v658_v52  ;;  %v665_v52 = vmul.f32 %v3607_v53, %v397_v46  ;;  %v403_v46 = vld [vmem:[%s1809_s22 + $0x340] sm:$0xff] }
 0x13b   : > { %1176 = vst [vmem:[%s1881_s8 + $0x2a8] sm:$0xff] %v920_v42  ;;  %v927_v42 = vadd.f32 %v1842_v23, %v659_v59  ;;  %v666_v59 = vmul.f32 %v3607_v53, %v398_v34  ;;  %v404_v34 = vld [vmem:[%s1809_s22 + $0x348] sm:$0xff] }
 0x13c   : > { %1177 = vst [vmem:[%s1881_s8 + $0x2b0] sm:$0xff] %v921_v58  ;;  %v928_v58 = vadd.f32 %v1842_v23, %v660_v31  ;;  %v667_v31 = vmul.f32 %v3607_v53, %v399_v51  ;;  %v405_v51 = vld [vmem:[%s1809_s22 + $0x350] sm:$0xff] }
 0x13d   : > { %1178 = vst [vmem:[%s1881_s8 + $0x2b8] sm:$0xff] %v922_v41  ;;  %v929_v41 = vadd.f32 %v1842_v23, %v661_v33  ;;  %v668_v33 = vmul.f32 %v3607_v53, %v400_v35  ;;  %v406_v35 = vld [vmem:[%s1809_s22 + $0x358] sm:$0xff] }
 0x13e   : > { %1179 = vst [vmem:[%s1881_s8 + $0x2c0] sm:$0xff] %v923_v60  ;;  %v930_v60 = vadd.f32 %v1842_v23, %v662_v30  ;;  %v669_v30 = vmul.f32 %v3607_v53, %v401_v15  ;;  %v407_v15 = vld [vmem:[%s1809_s22 + $0x360] sm:$0xff] }
 0x13f   : > { %1180 = vst [vmem:[%s1881_s8 + $0x2c8] sm:$0xff] %v924_v17  ;;  %v931_v17 = vadd.f32 %v1842_v23, %v663_v8  ;;  %v670_v8 = vmul.f32 %v3607_v53, %v402_v27  ;;  %v408_v27 = vld [vmem:[%s1809_s22 + $0x368] sm:$0xff] }
 0x140   : > { %1181 = vst [vmem:[%s1881_s8 + $0x2d0] sm:$0xff] %v925_v36  ;;  %v932_v36 = vadd.f32 %v1842_v23, %v664_v39  ;;  %v671_v39 = vmul.f32 %v3607_v53, %v403_v46  ;;  %v409_v46 = vld [vmem:[%s1809_s22 + $0x370] sm:$0xff] }
 0x141   : > { %1182 = vst [vmem:[%s1881_s8 + $0x2d8] sm:$0xff] %v926_v40  ;;  %v933_v40 = vadd.f32 %v1842_v23, %v665_v52  ;;  %v672_v52 = vmul.f32 %v3607_v53, %v404_v34  ;;  %v410_v34 = vld [vmem:[%s1809_s22 + $0x378] sm:$0xff] }
 0x142   : > { %1183 = vst [vmem:[%s1881_s8 + $0x2e0] sm:$0xff] %v927_v42  ;;  %v934_v42 = vadd.f32 %v1842_v23, %v666_v59  ;;  %v673_v59 = vmul.f32 %v3607_v53, %v405_v51  ;;  %v411_v51 = vld [vmem:[%s1809_s22 + $0x380] sm:$0xff] }
 0x143   : > { %1184 = vst [vmem:[%s1881_s8 + $0x2e8] sm:$0xff] %v928_v58  ;;  %v935_v58 = vadd.f32 %v1842_v23, %v667_v31  ;;  %v674_v31 = vmul.f32 %v3607_v53, %v406_v35  ;;  %v412_v35 = vld [vmem:[%s1809_s22 + $0x388] sm:$0xff] }
 0x144   : > { %1185 = vst [vmem:[%s1881_s8 + $0x2f0] sm:$0xff] %v929_v41  ;;  %v936_v41 = vadd.f32 %v1842_v23, %v668_v33  ;;  %v675_v33 = vmul.f32 %v3607_v53, %v407_v15  ;;  %v413_v15 = vld [vmem:[%s1809_s22 + $0x390] sm:$0xff] }
 0x145   : > { %1186 = vst [vmem:[%s1881_s8 + $0x2f8] sm:$0xff] %v930_v60  ;;  %v937_v60 = vadd.f32 %v1842_v23, %v669_v30  ;;  %v676_v30 = vmul.f32 %v3607_v53, %v408_v27  ;;  %v414_v27 = vld [vmem:[%s1809_s22 + $0x398] sm:$0xff] }
 0x146   : > { %1187 = vst [vmem:[%s1881_s8 + $0x300] sm:$0xff] %v931_v17  ;;  %v938_v17 = vadd.f32 %v1842_v23, %v670_v8  ;;  %v677_v8 = vmul.f32 %v3607_v53, %v409_v46  ;;  %v415_v46 = vld [vmem:[%s1809_s22 + $0x3a0] sm:$0xff] }
 0x147   : > { %1188 = vst [vmem:[%s1881_s8 + $0x308] sm:$0xff] %v932_v36  ;;  %v939_v36 = vadd.f32 %v1842_v23, %v671_v39  ;;  %v678_v39 = vmul.f32 %v3607_v53, %v410_v34  ;;  %v416_v34 = vld [vmem:[%s1809_s22 + $0x3a8] sm:$0xff] }
 0x148   : > { %1189 = vst [vmem:[%s1881_s8 + $0x310] sm:$0xff] %v933_v40  ;;  %v940_v40 = vadd.f32 %v1842_v23, %v672_v52  ;;  %v679_v52 = vmul.f32 %v3607_v53, %v411_v51  ;;  %v417_v51 = vld [vmem:[%s1809_s22 + $0x3b0] sm:$0xff] }
 0x149   : > { %1190 = vst [vmem:[%s1881_s8 + $0x318] sm:$0xff] %v934_v42  ;;  %v941_v42 = vadd.f32 %v1842_v23, %v673_v59  ;;  %v680_v59 = vmul.f32 %v3607_v53, %v412_v35  ;;  %v418_v35 = vld [vmem:[%s1809_s22 + $0x3b8] sm:$0xff] }
 0x14a   : > { %1191 = vst [vmem:[%s1881_s8 + $0x320] sm:$0xff] %v935_v58  ;;  %v942_v58 = vadd.f32 %v1842_v23, %v674_v31  ;;  %v681_v31 = vmul.f32 %v3607_v53, %v413_v15  ;;  %v419_v15 = vld [vmem:[%s1809_s22 + $0x3c0] sm:$0xff] }
 0x14b   : > { %1192 = vst [vmem:[%s1881_s8 + $0x328] sm:$0xff] %v936_v41  ;;  %v943_v41 = vadd.f32 %v1842_v23, %v675_v33  ;;  %v682_v33 = vmul.f32 %v3607_v53, %v414_v27  ;;  %v420_v27 = vld [vmem:[%s1809_s22 + $0x3c8] sm:$0xff] }
 0x14c   : > { %1193 = vst [vmem:[%s1881_s8 + $0x330] sm:$0xff] %v937_v60  ;;  %v944_v60 = vadd.f32 %v1842_v23, %v676_v30  ;;  %v683_v30 = vmul.f32 %v3607_v53, %v415_v46  ;;  %v421_v46 = vld [vmem:[%s1809_s22 + $0x3d0] sm:$0xff] }
 0x14d   : > { %1194 = vst [vmem:[%s1881_s8 + $0x338] sm:$0xff] %v938_v17  ;;  %v945_v17 = vadd.f32 %v1842_v23, %v677_v8  ;;  %v684_v8 = vmul.f32 %v3607_v53, %v416_v34  ;;  %v422_v34 = vld [vmem:[%s1809_s22 + $0x3d8] sm:$0xff] }
 0x14e   : > { %1195 = vst [vmem:[%s1881_s8 + $0x340] sm:$0xff] %v939_v36  ;;  %v946_v36 = vadd.f32 %v1842_v23, %v678_v39  ;;  %v685_v39 = vmul.f32 %v3607_v53, %v417_v51  ;;  %v423_v51 = vld [vmem:[%s1809_s22 + $0x3e0] sm:$0xff] }
 0x14f   : > { %1196 = vst [vmem:[%s1881_s8 + $0x348] sm:$0xff] %v940_v40  ;;  %v947_v40 = vadd.f32 %v1842_v23, %v679_v52  ;;  %v686_v52 = vmul.f32 %v3607_v53, %v418_v35  ;;  %v424_v35 = vld [vmem:[%s1809_s22 + $0x3e8] sm:$0xff] }
 0x150   : > { %1197 = vst [vmem:[%s1881_s8 + $0x350] sm:$0xff] %v941_v42  ;;  %v948_v42 = vadd.f32 %v1842_v23, %v680_v59  ;;  %v687_v59 = vmul.f32 %v3607_v53, %v419_v15  ;;  %v425_v15 = vld [vmem:[%s1809_s22 + $0x3f0] sm:$0xff] }
 0x151   : > { %1198 = vst [vmem:[%s1881_s8 + $0x358] sm:$0xff] %v942_v58  ;;  %v949_v58 = vadd.f32 %v1842_v23, %v681_v31  ;;  %v688_v31 = vmul.f32 %v3607_v53, %v420_v27  ;;  %v426_v27 = vld [vmem:[%s1809_s22 + $0x3f8] sm:$0xff] }
 0x152   : > { %1199 = vst [vmem:[%s1881_s8 + $0x360] sm:$0xff] %v943_v41  ;;  %v950_v41 = vadd.f32 %v1842_v23, %v682_v33  ;;  %v689_v33 = vmul.f32 %v3607_v53, %v421_v46  ;;  %v427_v46 = vld [vmem:[%s1809_s22 + $0x400] sm:$0xff] }
 0x153   : > { %1200 = vst [vmem:[%s1881_s8 + $0x368] sm:$0xff] %v944_v60  ;;  %v951_v60 = vadd.f32 %v1842_v23, %v683_v30  ;;  %v690_v30 = vmul.f32 %v3607_v53, %v422_v34  ;;  %v428_v34 = vld [vmem:[%s1809_s22 + $0x408] sm:$0xff] }
 0x154   : > { %1201 = vst [vmem:[%s1881_s8 + $0x370] sm:$0xff] %v945_v17  ;;  %v952_v17 = vadd.f32 %v1842_v23, %v684_v8  ;;  %v691_v8 = vmul.f32 %v3607_v53, %v423_v51  ;;  %v429_v51 = vld [vmem:[%s1809_s22 + $0x410] sm:$0xff] }
 0x155   : > { %1202 = vst [vmem:[%s1881_s8 + $0x378] sm:$0xff] %v946_v36  ;;  %v953_v36 = vadd.f32 %v1842_v23, %v685_v39  ;;  %v692_v39 = vmul.f32 %v3607_v53, %v424_v35  ;;  %v430_v35 = vld [vmem:[%s1809_s22 + $0x418] sm:$0xff] }
 0x156   : > { %1203 = vst [vmem:[%s1881_s8 + $0x380] sm:$0xff] %v947_v40  ;;  %v954_v40 = vadd.f32 %v1842_v23, %v686_v52  ;;  %v693_v52 = vmul.f32 %v3607_v53, %v425_v15  ;;  %v431_v15 = vld [vmem:[%s1809_s22 + $0x420] sm:$0xff] }
 0x157   : > { %1204 = vst [vmem:[%s1881_s8 + $0x388] sm:$0xff] %v948_v42  ;;  %v955_v42 = vadd.f32 %v1842_v23, %v687_v59  ;;  %v694_v59 = vmul.f32 %v3607_v53, %v426_v27  ;;  %v432_v53 = vld [vmem:[%s1809_s22 + $0x428] sm:$0xff]  ;;  %v433_v27 = vld [vmem:[%s1809_s22 + $0x430] sm:$0xff] }
 0x158   : > { %1205 = vst [vmem:[%s1881_s8 + $0x390] sm:$0xff] %v949_v58  ;;  %v956_v58 = vadd.f32 %v1842_v23, %v688_v31  ;;  %v695_v31 = vmul.f32 %v2103_v48, %v427_v46  ;;  %v434_v46 = vld [vmem:[%s1809_s22 + $0x438] sm:$0xff] }
 0x159   : > { %1206 = vst [vmem:[%s1881_s8 + $0x398] sm:$0xff] %v950_v41  ;;  %v957_v41 = vadd.f32 %v1842_v23, %v689_v33  ;;  %v696_v33 = vmul.f32 %v2103_v48, %v428_v34  ;;  %v435_v34 = vld [vmem:[%s1809_s22 + $0x440] sm:$0xff] }
 0x15a   : > { %1207 = vst [vmem:[%s1881_s8 + $0x3a0] sm:$0xff] %v951_v60  ;;  %v958_v60 = vadd.f32 %v1842_v23, %v690_v30  ;;  %v697_v30 = vmul.f32 %v2103_v48, %v429_v51  ;;  %v436_v51 = vld [vmem:[%s1809_s22 + $0x448] sm:$0xff] }
 0x15b   : > { %1208 = vst [vmem:[%s1881_s8 + $0x3a8] sm:$0xff] %v952_v17  ;;  %v959_v17 = vadd.f32 %v1842_v23, %v691_v8  ;;  %v698_v8 = vmul.f32 %v2103_v48, %v430_v35  ;;  %v702_v35 = vmul.f32 %v2103_v48, %v434_v46 }
 0x15c   : > { %1209 = vst [vmem:[%s1881_s8 + $0x3b0] sm:$0xff] %v953_v36  ;;  %v960_v36 = vadd.f32 %v1842_v23, %v692_v39  ;;  %v699_v39 = vmul.f32 %v2103_v48, %v431_v15  ;;  %v703_v15 = vmul.f32 %v2103_v48, %v435_v34 }
 0x15d   : > { %1210 = vst [vmem:[%s1881_s8 + $0x3b8] sm:$0xff] %v954_v40  ;;  %v961_v40 = vadd.f32 %v1842_v23, %v693_v52  ;;  %v700_v52 = vmul.f32 %v2103_v48, %v432_v53  ;;  %v704_v53 = vmul.f32 %v2103_v48, %v436_v51 }
 0x15e   : > { %1211 = vst [vmem:[%s1881_s8 + $0x3c0] sm:$0xff] %v955_v42  ;;  %v962_v42 = vadd.f32 %v1842_v23, %v694_v59  ;;  %v701_v23 = vmul.f32 %v2103_v48, %v433_v27  ;;  %v965_v59 = vadd.f32 %v2519_v57, %v697_v30 }
 0x15f   : > { %1212 = vst [vmem:[%s1881_s8 + $0x3c8] sm:$0xff] %v956_v58  ;;  %v963_v58 = vadd.f32 %v2519_v57, %v695_v31  ;;  %v966_v31 = vadd.f32 %v2519_v57, %v698_v8  ;;  %v968_v30 = vadd.f32 %v2519_v57, %v700_v52  ;;  %v971_v52 = vadd.f32 %v2519_v57, %v703_v15 }
 0x160   : > { %1213 = vst [vmem:[%s1881_s8 + $0x3d0] sm:$0xff] %v957_v41  ;;  %v964_v41 = vadd.f32 %v2519_v57, %v696_v33  ;;  %v967_v33 = vadd.f32 %v2519_v57, %v699_v39  ;;  %v969_v8 = vadd.f32 %v2519_v57, %v701_v23  ;;  %v970_v39 = vadd.f32 %v2519_v57, %v702_v35 }
 0x161   : > { %1214 = vst [vmem:[%s1881_s8 + $0x3d8] sm:$0xff] %v958_v60  ;;  %v437_v60 = vld [vmem:[%s1809_s22 + $0x450] sm:$0xff]  ;;  %v972_v23 = vadd.f32 %v2519_v57, %v704_v53 }
 0x162   : > { %1215 = vst [vmem:[%s1881_s8 + $0x3e0] sm:$0xff] %v959_v17  ;;  %v438_v17 = vld [vmem:[%s1809_s22 + $0x458] sm:$0xff]  ;;  %v705_v27 = vmul.f32 %v2103_v48, %v437_v60 }
 0x163   : > { %1216 = vst [vmem:[%s1881_s8 + $0x3e8] sm:$0xff] %v960_v36  ;;  %v439_v36 = vld [vmem:[%s1809_s22 + $0x460] sm:$0xff]  ;;  %v706_v46 = vmul.f32 %v2103_v48, %v438_v17 }
 0x164   : > { %1217 = vst [vmem:[%s1881_s8 + $0x3f0] sm:$0xff] %v961_v40  ;;  %v440_v40 = vld [vmem:[%s1809_s22 + $0x468] sm:$0xff]  ;;  %v707_v34 = vmul.f32 %v2103_v48, %v439_v36  ;;  %v973_v35 = vadd.f32 %v2519_v57, %v705_v27 }
 0x165   : > { %1218 = vst [vmem:[%s1881_s8 + $0x3f8] sm:$0xff] %v962_v42  ;;  %v441_v42 = vld [vmem:[%s1809_s22 + $0x470] sm:$0xff]  ;;  %v708_v51 = vmul.f32 %v2103_v48, %v440_v40  ;;  %v974_v15 = vadd.f32 %v2519_v57, %v706_v46 }
 0x166   : > { %1219 = vst [vmem:[%s1881_s8 + $0x400] sm:$0xff] %v963_v58  ;;  %v442_v58 = vld [vmem:[%s1809_s22 + $0x478] sm:$0xff]  ;;  %v709_v60 = vmul.f32 %v2103_v48, %v441_v42  ;;  %v975_v53 = vadd.f32 %v2519_v57, %v707_v34 }
 0x167   : > { %1220 = vst [vmem:[%s1881_s8 + $0x408] sm:$0xff] %v964_v41  ;;  %v443_v41 = vld [vmem:[%s1809_s22 + $0x480] sm:$0xff]  ;;  %v710_v17 = vmul.f32 %v2103_v48, %v442_v58  ;;  %v976_v27 = vadd.f32 %v2519_v57, %v708_v51 }
 0x168   : > { %1221 = vst [vmem:[%s1881_s8 + $0x410] sm:$0xff] %v965_v59  ;;  %v444_v59 = vld [vmem:[%s1809_s22 + $0x488] sm:$0xff]  ;;  %v711_v36 = vmul.f32 %v2103_v48, %v443_v41  ;;  %v977_v46 = vadd.f32 %v2519_v57, %v709_v60 }
 0x169   : > { %1222 = vst [vmem:[%s1881_s8 + $0x418] sm:$0xff] %v966_v31  ;;  %v445_v31 = vld [vmem:[%s1809_s22 + $0x490] sm:$0xff]  ;;  %v712_v40 = vmul.f32 %v2103_v48, %v444_v59  ;;  %v978_v34 = vadd.f32 %v2519_v57, %v710_v17 }
 0x16a   : > { %1223 = vst [vmem:[%s1881_s8 + $0x420] sm:$0xff] %v967_v33  ;;  %v446_v33 = vld [vmem:[%s1809_s22 + $0x498] sm:$0xff]  ;;  %v713_v42 = vmul.f32 %v2103_v48, %v445_v31  ;;  %v979_v51 = vadd.f32 %v2519_v57, %v711_v36 }
 0x16b   : > { %1224 = vst [vmem:[%s1881_s8 + $0x428] sm:$0xff] %v968_v30  ;;  %v447_v30 = vld [vmem:[%s1809_s22 + $0x4a0] sm:$0xff]  ;;  %v714_v58 = vmul.f32 %v2103_v48, %v446_v33  ;;  %v980_v60 = vadd.f32 %v2519_v57, %v712_v40 }
 0x16c   : > { %1225 = vst [vmem:[%s1881_s8 + $0x430] sm:$0xff] %v969_v8  ;;  %v448_v8 = vld [vmem:[%s1809_s22 + $0x4a8] sm:$0xff]  ;;  %v715_v41 = vmul.f32 %v2103_v48, %v447_v30  ;;  %v981_v17 = vadd.f32 %v2519_v57, %v713_v42 }
 0x16d   : > { %1226 = vst [vmem:[%s1881_s8 + $0x438] sm:$0xff] %v970_v39  ;;  %v449_v39 = vld [vmem:[%s1809_s22 + $0x4b0] sm:$0xff]  ;;  %v716_v59 = vmul.f32 %v2103_v48, %v448_v8  ;;  %v982_v36 = vadd.f32 %v2519_v57, %v714_v58 }
 0x16e   : > { %1227 = vst [vmem:[%s1881_s8 + $0x440] sm:$0xff] %v971_v52  ;;  %v450_v52 = vld [vmem:[%s1809_s22 + $0x4b8] sm:$0xff]  ;;  %v717_v31 = vmul.f32 %v2103_v48, %v449_v39  ;;  %v983_v40 = vadd.f32 %v2519_v57, %v715_v41 }
 0x16f   : > { %1228 = vst [vmem:[%s1881_s8 + $0x448] sm:$0xff] %v972_v23  ;;  %v451_v23 = vld [vmem:[%s1809_s22 + $0x4c0] sm:$0xff]  ;;  %v718_v33 = vmul.f32 %v2103_v48, %v450_v52  ;;  %v984_v42 = vadd.f32 %v2519_v57, %v716_v59 }
 0x170   : > { %1229 = vst [vmem:[%s1881_s8 + $0x450] sm:$0xff] %v973_v35  ;;  %v452_v35 = vld [vmem:[%s1809_s22 + $0x4c8] sm:$0xff]  ;;  %v719_v30 = vmul.f32 %v2103_v48, %v451_v23  ;;  %v985_v58 = vadd.f32 %v2519_v57, %v717_v31 }
 0x171   : > { %1230 = vst [vmem:[%s1881_s8 + $0x458] sm:$0xff] %v974_v15  ;;  %v453_v15 = vld [vmem:[%s1809_s22 + $0x4d0] sm:$0xff]  ;;  %v720_v8 = vmul.f32 %v2103_v48, %v452_v35  ;;  %v986_v41 = vadd.f32 %v2519_v57, %v718_v33 }
 0x172   : > { %1231 = vst [vmem:[%s1881_s8 + $0x460] sm:$0xff] %v975_v53  ;;  %v454_v53 = vld [vmem:[%s1809_s22 + $0x4d8] sm:$0xff]  ;;  %v721_v39 = vmul.f32 %v2103_v48, %v453_v15  ;;  %v987_v59 = vadd.f32 %v2519_v57, %v719_v30 }
 0x173   : > { %1232 = vst [vmem:[%s1881_s8 + $0x468] sm:$0xff] %v976_v27  ;;  %v455_v27 = vld [vmem:[%s1809_s22 + $0x4e0] sm:$0xff]  ;;  %v722_v52 = vmul.f32 %v2103_v48, %v454_v53  ;;  %v988_v31 = vadd.f32 %v2519_v57, %v720_v8 }
 0x174   : > { %1233 = vst [vmem:[%s1881_s8 + $0x470] sm:$0xff] %v977_v46  ;;  %v456_v46 = vld [vmem:[%s1809_s22 + $0x4e8] sm:$0xff]  ;;  %v723_v23 = vmul.f32 %v2103_v48, %v455_v27  ;;  %v989_v33 = vadd.f32 %v2519_v57, %v721_v39 }
 0x175   : > { %1234 = vst [vmem:[%s1881_s8 + $0x478] sm:$0xff] %v978_v34  ;;  %v457_v34 = vld [vmem:[%s1809_s22 + $0x4f0] sm:$0xff]  ;;  %v724_v35 = vmul.f32 %v2103_v48, %v456_v46  ;;  %v990_v30 = vadd.f32 %v2519_v57, %v722_v52 }
 0x176   : > { %1235 = vst [vmem:[%s1881_s8 + $0x480] sm:$0xff] %v979_v51  ;;  %v458_v51 = vld [vmem:[%s1809_s22 + $0x4f8] sm:$0xff]  ;;  %v725_v15 = vmul.f32 %v2103_v48, %v457_v34  ;;  %v991_v8 = vadd.f32 %v2519_v57, %v723_v23 }
 0x177   : > { %1236 = vst [vmem:[%s1881_s8 + $0x488] sm:$0xff] %v980_v60  ;;  %v459_v60 = vld [vmem:[%s1809_s22 + $0x500] sm:$0xff]  ;;  %v726_v53 = vmul.f32 %v2103_v48, %v458_v51  ;;  %v992_v39 = vadd.f32 %v2519_v57, %v724_v35 }
 0x178   : > { %1237 = vst [vmem:[%s1881_s8 + $0x490] sm:$0xff] %v981_v17  ;;  %v460_v17 = vld [vmem:[%s1809_s22 + $0x508] sm:$0xff]  ;;  %v727_v27 = vmul.f32 %v2103_v48, %v459_v60  ;;  %v993_v52 = vadd.f32 %v2519_v57, %v725_v15 }
 0x179   : > { %1238 = vst [vmem:[%s1881_s8 + $0x498] sm:$0xff] %v982_v36  ;;  %v461_v36 = vld [vmem:[%s1809_s22 + $0x510] sm:$0xff]  ;;  %v728_v46 = vmul.f32 %v2103_v48, %v460_v17  ;;  %v994_v23 = vadd.f32 %v2519_v57, %v726_v53 }
 0x17a   : > { %1239 = vst [vmem:[%s1881_s8 + $0x4a0] sm:$0xff] %v983_v40  ;;  %v462_v40 = vld [vmem:[%s1809_s22 + $0x518] sm:$0xff]  ;;  %v729_v34 = vmul.f32 %v2103_v48, %v461_v36  ;;  %v995_v35 = vadd.f32 %v2519_v57, %v727_v27 }
 0x17b   : > { %1240 = vst [vmem:[%s1881_s8 + $0x4a8] sm:$0xff] %v984_v42  ;;  %v463_v42 = vld [vmem:[%s1809_s22 + $0x520] sm:$0xff]  ;;  %v730_v51 = vmul.f32 %v2103_v48, %v462_v40  ;;  %v996_v15 = vadd.f32 %v2519_v57, %v728_v46 }
 0x17c   : > { %1241 = vst [vmem:[%s1881_s8 + $0x4b0] sm:$0xff] %v985_v58  ;;  %v464_v58 = vld [vmem:[%s1809_s22 + $0x528] sm:$0xff]  ;;  %v731_v60 = vmul.f32 %v2103_v48, %v463_v42  ;;  %v997_v53 = vadd.f32 %v2519_v57, %v729_v34 }
 0x17d   : > { %1242 = vst [vmem:[%s1881_s8 + $0x4b8] sm:$0xff] %v986_v41  ;;  %v465_v41 = vld [vmem:[%s1809_s22 + $0x530] sm:$0xff]  ;;  %v732_v17 = vmul.f32 %v2103_v48, %v464_v58  ;;  %v998_v27 = vadd.f32 %v2519_v57, %v730_v51 }
 0x17e   : > { %1243 = vst [vmem:[%s1881_s8 + $0x4c0] sm:$0xff] %v987_v59  ;;  %v466_v59 = vld [vmem:[%s1809_s22 + $0x538] sm:$0xff]  ;;  %v733_v36 = vmul.f32 %v2103_v48, %v465_v41  ;;  %v999_v46 = vadd.f32 %v2519_v57, %v731_v60 }
 0x17f   : > { %1244 = vst [vmem:[%s1881_s8 + $0x4c8] sm:$0xff] %v988_v31  ;;  %v467_v31 = vld [vmem:[%s1809_s22 + $0x540] sm:$0xff]  ;;  %v734_v40 = vmul.f32 %v2103_v48, %v466_v59  ;;  %v1000_v34 = vadd.f32 %v2519_v57, %v732_v17 }
 0x180   : > { %1245 = vst [vmem:[%s1881_s8 + $0x4d0] sm:$0xff] %v989_v33  ;;  %v468_v33 = vld [vmem:[%s1809_s22 + $0x548] sm:$0xff]  ;;  %v735_v42 = vmul.f32 %v2103_v48, %v467_v31  ;;  %v1001_v51 = vadd.f32 %v2519_v57, %v733_v36 }
 0x181   : > { %1246 = vst [vmem:[%s1881_s8 + $0x4d8] sm:$0xff] %v990_v30  ;;  %v469_v30 = vld [vmem:[%s1809_s22 + $0x550] sm:$0xff]  ;;  %v736_v58 = vmul.f32 %v2103_v48, %v468_v33  ;;  %v1002_v60 = vadd.f32 %v2519_v57, %v734_v40 }
 0x182   : > { %1247 = vst [vmem:[%s1881_s8 + $0x4e0] sm:$0xff] %v991_v8  ;;  %v470_v8 = vld [vmem:[%s1809_s22 + $0x558] sm:$0xff]  ;;  %v737_v41 = vmul.f32 %v2103_v48, %v469_v30  ;;  %v1003_v17 = vadd.f32 %v2519_v57, %v735_v42 }
 0x183   : > { %1248 = vst [vmem:[%s1881_s8 + $0x4e8] sm:$0xff] %v992_v39  ;;  %v471_v39 = vld [vmem:[%s1809_s22 + $0x560] sm:$0xff]  ;;  %v738_v59 = vmul.f32 %v2103_v48, %v470_v8  ;;  %v1004_v36 = vadd.f32 %v2519_v57, %v736_v58 }
 0x184   : > { %1249 = vst [vmem:[%s1881_s8 + $0x4f0] sm:$0xff] %v993_v52  ;;  %v472_v52 = vld [vmem:[%s1809_s22 + $0x568] sm:$0xff]  ;;  %v739_v31 = vmul.f32 %v2103_v48, %v471_v39  ;;  %v1005_v40 = vadd.f32 %v2519_v57, %v737_v41 }
 0x185   : > { %1250 = vst [vmem:[%s1881_s8 + $0x4f8] sm:$0xff] %v994_v23  ;;  %v473_v23 = vld [vmem:[%s1809_s22 + $0x570] sm:$0xff]  ;;  %v740_v33 = vmul.f32 %v2103_v48, %v472_v52  ;;  %v1006_v42 = vadd.f32 %v2519_v57, %v738_v59 }
 0x186   : > { %1251 = vst [vmem:[%s1881_s8 + $0x500] sm:$0xff] %v995_v35  ;;  %v474_v35 = vld [vmem:[%s1809_s22 + $0x578] sm:$0xff]  ;;  %v741_v30 = vmul.f32 %v2103_v48, %v473_v23  ;;  %v1007_v58 = vadd.f32 %v2519_v57, %v739_v31 }
 0x187   : > { %1252 = vst [vmem:[%s1881_s8 + $0x508] sm:$0xff] %v996_v15  ;;  %v475_v15 = vld [vmem:[%s1809_s22 + $0x580] sm:$0xff]  ;;  %v742_v8 = vmul.f32 %v2103_v48, %v474_v35  ;;  %v1008_v41 = vadd.f32 %v2519_v57, %v740_v33 }
 0x188   : > { %1253 = vst [vmem:[%s1881_s8 + $0x510] sm:$0xff] %v997_v53  ;;  %v476_v53 = vld [vmem:[%s1809_s22 + $0x588] sm:$0xff]  ;;  %v743_v39 = vmul.f32 %v2103_v48, %v475_v15  ;;  %v1009_v59 = vadd.f32 %v2519_v57, %v741_v30 }
 0x189   : > { %1254 = vst [vmem:[%s1881_s8 + $0x518] sm:$0xff] %v998_v27  ;;  %v477_v27 = vld [vmem:[%s1809_s22 + $0x590] sm:$0xff]  ;;  %v744_v52 = vmul.f32 %v2103_v48, %v476_v53  ;;  %v1010_v31 = vadd.f32 %v2519_v57, %v742_v8 }
 0x18a   : > { %1255 = vst [vmem:[%s1881_s8 + $0x520] sm:$0xff] %v999_v46  ;;  %v478_v46 = vld [vmem:[%s1809_s22 + $0x598] sm:$0xff]  ;;  %v745_v23 = vmul.f32 %v2103_v48, %v477_v27  ;;  %v1011_v33 = vadd.f32 %v2519_v57, %v743_v39 }
 0x18b   : > { %1256 = vst [vmem:[%s1881_s8 + $0x528] sm:$0xff] %v1000_v34  ;;  %v479_v34 = vld [vmem:[%s1809_s22 + $0x5a0] sm:$0xff]  ;;  %v746_v35 = vmul.f32 %v2103_v48, %v478_v46  ;;  %v1012_v30 = vadd.f32 %v2519_v57, %v744_v52 }
 0x18c   : > { %1257 = vst [vmem:[%s1881_s8 + $0x530] sm:$0xff] %v1001_v51  ;;  %v480_v51 = vld [vmem:[%s1809_s22 + $0x5a8] sm:$0xff]  ;;  %v747_v15 = vmul.f32 %v2103_v48, %v479_v34  ;;  %v1013_v8 = vadd.f32 %v2519_v57, %v745_v23 }
 0x18d   : > { %1258 = vst [vmem:[%s1881_s8 + $0x538] sm:$0xff] %v1002_v60  ;;  %v481_v60 = vld [vmem:[%s1809_s22 + $0x5b0] sm:$0xff]  ;;  %v748_v53 = vmul.f32 %v2103_v48, %v480_v51  ;;  %v1014_v39 = vadd.f32 %v2519_v57, %v746_v35 }
 0x18e   : > { %1259 = vst [vmem:[%s1881_s8 + $0x540] sm:$0xff] %v1003_v17  ;;  %v482_v17 = vld [vmem:[%s1809_s22 + $0x5b8] sm:$0xff]  ;;  %v749_v27 = vmul.f32 %v2103_v48, %v481_v60  ;;  %v1015_v52 = vadd.f32 %v2519_v57, %v747_v15 }
 0x18f   : > { %1260 = vst [vmem:[%s1881_s8 + $0x548] sm:$0xff] %v1004_v36  ;;  %v483_v36 = vld [vmem:[%s1809_s22 + $0x5c0] sm:$0xff]  ;;  %v750_v46 = vmul.f32 %v2103_v48, %v482_v17  ;;  %v1016_v23 = vadd.f32 %v2519_v57, %v748_v53 }
 0x190   : > { %1261 = vst [vmem:[%s1881_s8 + $0x550] sm:$0xff] %v1005_v40  ;;  %v484_v40 = vld [vmem:[%s1809_s22 + $0x5c8] sm:$0xff]  ;;  %v751_v34 = vmul.f32 %v2103_v48, %v483_v36  ;;  %v1017_v35 = vadd.f32 %v2519_v57, %v749_v27 }
 0x191   : > { %1262 = vst [vmem:[%s1881_s8 + $0x558] sm:$0xff] %v1006_v42  ;;  %v485_v42 = vld [vmem:[%s1809_s22 + $0x5d0] sm:$0xff]  ;;  %v752_v51 = vmul.f32 %v2103_v48, %v484_v40  ;;  %v1018_v15 = vadd.f32 %v2519_v57, %v750_v46 }
 0x192   : > { %1263 = vst [vmem:[%s1881_s8 + $0x560] sm:$0xff] %v1007_v58  ;;  %v486_v58 = vld [vmem:[%s1809_s22 + $0x5d8] sm:$0xff]  ;;  %v753_v60 = vmul.f32 %v2103_v48, %v485_v42  ;;  %v1019_v53 = vadd.f32 %v2519_v57, %v751_v34 }
 0x193   : > { %1264 = vst [vmem:[%s1881_s8 + $0x568] sm:$0xff] %v1008_v41  ;;  %v487_v41 = vld [vmem:[%s1809_s22 + $0x5e0] sm:$0xff]  ;;  %v754_v17 = vmul.f32 %v2103_v48, %v486_v58  ;;  %v1020_v40 = vadd.f32 %v2519_v57, %v752_v51 }
 0x194   : > { %1265 = vst [vmem:[%s1881_s8 + $0x570] sm:$0xff] %v1009_v59  ;;  %v488_v59 = vld [vmem:[%s1809_s22 + $0x5e8] sm:$0xff]  ;;  %v755_v36 = vmul.f32 %v2103_v48, %v487_v41 }
 0x195   : > { %1266 = vst [vmem:[%s1881_s8 + $0x578] sm:$0xff] %v1010_v31  ;;  %v489_v31 = vld [vmem:[%s1809_s22 + $0x5f0] sm:$0xff]  ;;  %v1022_v46 = vadd.f32 %v2519_v57, %v754_v17 }
 0x196   : > { %1267 = vst [vmem:[%s1881_s8 + $0x580] sm:$0xff] %v1011_v33  ;;  %v490_v33 = vld [vmem:[%s1809_s22 + $0x5f8] sm:$0xff]  ;;  %v757_v27 = vmul.f32 %v2103_v48, %v489_v31  ;;  %s1634_s22 = sshra.s32 %s1368_s21, 4  ;;  %s1635_s22 = int_to_ptr.hbm [resolvable:$true] %s1634_s22 }
 0x197   : > { %1268 = vst [vmem:[%s1881_s8 + $0x588] sm:$0xff] %v1012_v30  ;;  %v756_v30 = vmul.f32 %v2103_v48, %v488_v59  ;;  %v758_v42 = vmul.f32 %v2103_v48, %v490_v33  ;;  %s1636_s28 = scalar_lea.hbm %s1635_s22, 2048  ;;  %p1641_p8 = scmp.lt.s32.totalorder %s1635_s22, %s3495_s3 }
 0x198   : > { %1269 = vst [vmem:[%s1881_s8 + $0x590] sm:$0xff] %v1013_v8  ;;  %v1021_v8 = vadd.f32 %v2519_v57, %v753_v60  ;;  %v1025_v34 = vadd.f32 %v2519_v57, %v757_v27  ;;  %p1637_p5 = scmp.ne.s32.totalorder %s1635_s22, %s1636_s28  ;;  %p1642_p10 = scmp.lt.s32.totalorder %s1640_s4, %s1636_s28 }
 0x199   : > { %1270 = vst [vmem:[%s1881_s8 + $0x598] sm:$0xff] %v1014_v39  ;;  %v1023_v39 = vadd.f32 %v2519_v57, %v755_v36  ;;  %v1024_v58 = vadd.f32 %v2519_v57, %v756_v30  ;;  %v1026_v48 = vadd.f32 %v2519_v57, %v758_v42  ;;  %v3612_v57 = vld [vmem:[#allocation9_spill] sm:$0xff] }
 0x19a   : > { %1271 = vst [vmem:[%s1881_s8 + $0x5a0] sm:$0xff] %v1015_v52  ;;  %p1638_p6 = pnand %p1637_p5, %p1780_p9  ;;  %p1643_p13 = por %p1642_p10, %p1641_p8 }
 0x19b   : > { %1272 = vst [vmem:[%s1881_s8 + $0x5a8] sm:$0xff] %v1016_v23 }
 0x19c   : > { %1273 = vst [vmem:[%s1881_s8 + $0x5b0] sm:$0xff] %v1017_v35  ;;  %p1639_p7 = pneg %p1638_p6 }
 0x19d   : > { %1274 = vst [vmem:[%s1881_s8 + $0x5b8] sm:$0xff] %v1018_v15 }
 0x19e   : > { %1275 = vst [vmem:[%s1881_s8 + $0x5c0] sm:$0xff] %v1019_v53  ;;  %p1644_p0 = pnand %p1643_p13, %p1639_p7 }
 0x19f   : > { %1276 = vst [vmem:[%s1881_s8 + $0x5c8] sm:$0xff] %v1020_v40 }
 0x1a0   : > { %1277 = vst [vmem:[%s1881_s8 + $0x5d0] sm:$0xff] %v1021_v8 }
 0x1a1   : > { %1278 = vst [vmem:[%s1881_s8 + $0x5d8] sm:$0xff] %v1022_v46 }
 0x1a2   : > { %1279 = vst [vmem:[%s1881_s8 + $0x5e0] sm:$0xff] %v1023_v39 }
 0x1a3   : > { %1280 = vst [vmem:[%s1881_s8 + $0x5e8] sm:$0xff] %v1024_v58 }
 0x1a4   : > { %1281 = vst [vmem:[%s1881_s8 + $0x5f0] sm:$0xff] %v1025_v34 }
 0x1a5   : > { %1282 = vst [vmem:[%s1881_s8 + $0x5f8] sm:$0xff] %v1026_v48 }
 0x1a6   : > { %1283 = vst [vmem:[%s1881_s8 + $0x600] sm:$0xff] %v2540_v28  ;;  %v3613_v28 = vld [vmem:[#allocation10_spill] sm:$0xff] }
 0x1a7   : > { %1284 = vst [vmem:[%s1881_s8 + $0x608] sm:$0xff] %v2544_v32  ;;  %v3614_v32 = vld [vmem:[#allocation11_spill] sm:$0xff] }
 0x1a8   : > { %1285 = vst [vmem:[%s1881_s8 + $0x610] sm:$0xff] %v2548_v25  ;;  %v3615_v25 = vld [vmem:[#allocation12_spill] sm:$0xff] }
 0x1a9   : > { %1286 = vst [vmem:[%s1881_s8 + $0x618] sm:$0xff] %v2552_v44  ;;  %v3616_v44 = vld [vmem:[#allocation13_spill] sm:$0xff] }
 0x1aa   : > { %1287 = vst [vmem:[%s1881_s8 + $0x620] sm:$0xff] %v2557_v43  ;;  %v3617_v43 = vld [vmem:[#allocation14_spill] sm:$0xff] }
 0x1ab   : > { %1288 = vst [vmem:[%s1881_s8 + $0x628] sm:$0xff] %v2561_v50  ;;  %v3618_v50 = vld [vmem:[#allocation19_spill] sm:$0xff] }
 0x1ac   : > { %1289 = vst [vmem:[%s1881_s8 + $0x630] sm:$0xff] %v2565_v38  ;;  %v3619_v38 = vld [vmem:[#allocation20_spill] sm:$0xff] }
 0x1ad   : > { %1290 = vst [vmem:[%s1881_s8 + $0x638] sm:$0xff] %v2569_v37  ;;  %v3620_v37 = vld [vmem:[#allocation21_spill] sm:$0xff] }
 0x1ae   : > { %1291 = vst [vmem:[%s1881_s8 + $0x640] sm:$0xff] %v3612_v57 }
 0x1af   : > { %1292 = vst [vmem:[%s1881_s8 + $0x648] sm:$0xff] %v2578_v5  ;;  %v3622_v5 = vld [vmem:[#allocation23_spill] sm:$0xff] }
 0x1b0   : > { %1293 = vst [vmem:[%s1881_s8 + $0x650] sm:$0xff] %v3613_v28 }
 0x1b1   : > { %1294 = vst [vmem:[%s1881_s8 + $0x658] sm:$0xff] %v2586_v47  ;;  %v3624_v47 = vld [vmem:[#allocation25_spill] sm:$0xff] }
 0x1b2   : > { %1295 = vst [vmem:[%s1881_s8 + $0x660] sm:$0xff] %v2591_v0  ;;  %v3625_v0 = vld [vmem:[#allocation26_spill] sm:$0xff] }
 0x1b3   : > { %1296 = vst [vmem:[%s1881_s8 + $0x668] sm:$0xff] %v3614_v32 }
 0x1b4   : > { %1297 = vst [vmem:[%s1881_s8 + $0x670] sm:$0xff] %v3615_v25 }
 0x1b5   : > { %1298 = vst [vmem:[%s1881_s8 + $0x678] sm:$0xff] %v2603_v45  ;;  %v3623_v45 = vld [vmem:[#allocation24_spill] sm:$0xff] }
 0x1b6   : > { %1299 = vst [vmem:[%s1881_s8 + $0x680] sm:$0xff] %v2608_v29  ;;  %v3627_v29 = vld [vmem:[#allocation28_spill] sm:$0xff] }
 0x1b7   : > { %1300 = vst [vmem:[%s1881_s8 + $0x688] sm:$0xff] %v3616_v44 }
 0x1b8   : > { %1301 = vst [vmem:[%s1881_s8 + $0x690] sm:$0xff] %v2616_v3  ;;  %v3621_v3 = vld [vmem:[#allocation22_spill] sm:$0xff] }
 0x1b9   : > { %1302 = vst [vmem:[%s1881_s8 + $0x698] sm:$0xff] %v2620_v16  ;;  %v3626_v16 = vld [vmem:[#allocation27_spill] sm:$0xff] }
 0x1ba   : > { %1303 = vst [vmem:[%s1881_s8 + $0x6a0] sm:$0xff] %v3617_v43 }
 0x1bb   : > { %1304 = vst [vmem:[%s1881_s8 + $0x6a8] sm:$0xff] %v2629_v55  ;;  %v3630_v55 = vld [vmem:[#allocation31_spill] sm:$0xff] }
 0x1bc   : > { %1305 = vst [vmem:[%s1881_s8 + $0x6b0] sm:$0xff] %v3618_v50 }
 0x1bd   : > { %1306 = vst [vmem:[%s1881_s8 + $0x6b8] sm:$0xff] %v2637_v54  ;;  %v3631_v54 = vld [vmem:[#allocation32_spill] sm:$0xff] }
 0x1be   : > { %1307 = vst [vmem:[%s1881_s8 + $0x6c0] sm:$0xff] %v2642_v1  ;;  %v3632_v1 = vld [vmem:[#allocation33_spill] sm:$0xff] }
 0x1bf   : > { %1308 = vst [vmem:[%s1881_s8 + $0x6c8] sm:$0xff] %v3619_v38 }
 0x1c0   : > { %1309 = vst [vmem:[%s1881_s8 + $0x6d0] sm:$0xff] %v3620_v37 }
 0x1c1   : > { %1310 = vst [vmem:[%s1881_s8 + $0x6d8] sm:$0xff] %v2654_v2  ;;  %v3628_v2 = vld [vmem:[#allocation29_spill] sm:$0xff] }
 0x1c2   : > { %1311 = vst [vmem:[%s1881_s8 + $0x6e0] sm:$0xff] %v2659_v9  ;;  %v3634_v9 = vld [vmem:[#allocation35_spill] sm:$0xff] }
 0x1c3   : > { %1312 = vst [vmem:[%s1881_s8 + $0x6e8] sm:$0xff] %v3621_v3 }
 0x1c4   : > { %1313 = vst [vmem:[%s1881_s8 + $0x6f0] sm:$0xff] %v2667_v26  ;;  %v3629_v26 = vld [vmem:[#allocation30_spill] sm:$0xff] }
 0x1c5   : > { %1314 = vst [vmem:[%s1881_s8 + $0x6f8] sm:$0xff] %v2671_v49  ;;  %v3633_v49 = vld [vmem:[#allocation34_spill] sm:$0xff] }
 0x1c6   : > { %1315 = vst [vmem:[%s1881_s8 + $0x700] sm:$0xff] %v3622_v5 }
 0x1c7   : > { %1316 = vst [vmem:[%s1881_s8 + $0x708] sm:$0xff] %v2680_v63 }
 0x1c8   : > { %1317 = vst [vmem:[%s1881_s8 + $0x710] sm:$0xff] %v3623_v45 }
 0x1c9   : > { %1318 = vst [vmem:[%s1881_s8 + $0x718] sm:$0xff] %v2688_v62 }
 0x1ca   : > { %1319 = vst [vmem:[%s1881_s8 + $0x720] sm:$0xff] %v2693_v11 }
 0x1cb   : > { %1320 = vst [vmem:[%s1881_s8 + $0x728] sm:$0xff] %v3624_v47 }
 0x1cc   : > { %1321 = vst [vmem:[%s1881_s8 + $0x730] sm:$0xff] %v3625_v0 }
 0x1cd   : > { %1322 = vst [vmem:[%s1881_s8 + $0x738] sm:$0xff] %v2705_v56  ;;  %v3635_v56 = vld [vmem:[#allocation36_spill] sm:$0xff] }
 0x1ce   : > { %1323 = vst [vmem:[%s1881_s8 + $0x740] sm:$0xff] %v2711_v18 }
 0x1cf   : > { %1324 = vst [vmem:[%s1881_s8 + $0x748] sm:$0xff] %v3626_v16 }
 0x1d0   : > { %1325 = vst [vmem:[%s1881_s8 + $0x750] sm:$0xff] %v2719_v13 }
 0x1d1   : > { %1326 = vst [vmem:[%s1881_s8 + $0x758] sm:$0xff] %v2723_v6 }
 0x1d2   : > { %1327 = vst [vmem:[%s1881_s8 + $0x760] sm:$0xff] %v3627_v29 }
 0x1d3   : > { %1328 = vst [vmem:[%s1881_s8 + $0x768] sm:$0xff] %v2733_v4 }
 0x1d4   : > { %1329 = vst [vmem:[%s1881_s8 + $0x770] sm:$0xff] %v2737_v10 }
 0x1d5   : > { %1330 = vst [vmem:[%s1881_s8 + $0x778] sm:$0xff] %v2741_v61 }
 0x1d6   : > { %1331 = vst [vmem:[%s1881_s8 + $0x780] sm:$0xff] %v2747_v24 }
 0x1d7   : > { %1332 = vst [vmem:[%s1881_s8 + $0x788] sm:$0xff] %v2751_v22 }
 0x1d8   : > { %1333 = vst [vmem:[%s1881_s8 + $0x790] sm:$0xff] %v2755_v7 }
 0x1d9   : > { %1334 = vst [vmem:[%s1881_s8 + $0x798] sm:$0xff] %v2759_v14 }
 0x1da   : > { %1335 = vst [vmem:[%s1881_s8 + $0x7a0] sm:$0xff] %v2766_v20 }
 0x1db   : > { %1336 = vst [vmem:[%s1881_s8 + $0x7a8] sm:$0xff] %v2770_v19 }
 0x1dc   : > { %1337 = vst [vmem:[%s1881_s8 + $0x7b0] sm:$0xff] %v2774_v12 }
 0x1dd   : > { %1338 = vst [vmem:[%s1881_s8 + $0x7b8] sm:$0xff] %v2778_v21 }
 0x1de   : > { %1339 = vst [vmem:[%s1881_s8 + $0x7c0] sm:$0xff] %v3628_v2 }
 0x1df   : > { %1340 = vst [vmem:[%s1881_s8 + $0x7c8] sm:$0xff] %v3629_v26 }
 0x1e0   : > { %1341 = vst [vmem:[%s1881_s8 + $0x7d0] sm:$0xff] %v3630_v55 }
 0x1e1   : > { %1342 = vst [vmem:[%s1881_s8 + $0x7d8] sm:$0xff] %v3631_v54 }
 0x1e2   : > { %1343 = vst [vmem:[%s1881_s8 + $0x7e0] sm:$0xff] %v3632_v1 }
 0x1e3   : > { %1344 = vst [vmem:[%s1881_s8 + $0x7e8] sm:$0xff] %v3633_v49 }
 0x1e4   : > { %1345 = vst [vmem:[%s1881_s8 + $0x7f0] sm:$0xff] %v3634_v9 }
 0x1e5   : > { %1346 = vst [vmem:[%s1881_s8 + $0x7f8] sm:$0xff] %v3635_v56 }
 0x1e6   : > { %1647 = shalt.err (!%p1644_p0)
}
 0x1e7   : > { %s1707_s19 = smov 16384   ;;  %s1708_s24 = smov 1024  }
 0x1e8   : > { %1523 = dma.vmem_to_hbm [thread:$0]  (%p1780_p9), %s1366_s15, 32768, %s1368_s21, %s1348_s23, %s1707_s19, %s1707_s19, %s1708_s24  }
 0x1e9 PF: > { %s1382_s7 = sand.u32 1, %s1682_s12   ;;  %p1530_p1 = pnand %p1501_p12, %p1787_p11 }
 0x1ea   : > { %s1383_s8 = scalar_lea.sflag [#allocation4], %s1382_s7 }
 0x1eb   : > { %p1531_p2 = pneg %p1530_p1 }
 0x1ed   : > { %1677 = dma.done.wait (%p1531_p2), %s1383_s8, 32768  }
 0x1ee   : > { %1679 = vsyncadd (%p1531_p2), %s1383_s8, 4294934528  ;;  %s19_s17 = sadd.s32 1, %s1702_s17   ;;  %s3636_s12 = smov %s1686_s13 }
 0x1ef   : > { %p16_p3 = scmp.ge.s32.totalorder %s19_s17, 4   ;;  %s3637_s13 = smov %s1690_s14 }
 0x1f0   : > { %s3638_s14 = smov %s1785_s26  ;;  %s3639_s15 = smov %s1698_s16 }
 0x1f1   : > { %s3640_s16 = smov %s3642_s20  ;;  %18 = sbr.rel (!%p16_p3) target bundleno = 6 (0x6), region = 83 }
 0x1f6   :  { %1389 = vsyncpa [#allocation3], 1 }
 0x1f7   :  { %1391 = vsyncpa [#allocation3 + $0x1], 1 }
 0x1f8   :  { %1392 = vsyncpa [#allocation4], 1 }
 0x1f9   :  { %1394 = vsyncpa [#allocation4 + $0x1], 1 }

</bundles_post_ra>
